<compile_context>
chip_gen: v7x
topology: tpu7x:2x2x1
jax: 0.10.0
libtpu: 0.0.40
codegen_flags: <defaults>
</compile_context>

<pallas_src>
import jax
import jax.numpy as jnp
from jax.experimental import pallas as pl
from jax.experimental.pallas import tpu as pltpu

# ----------------------------- small BERT config -----------------------------
VOCAB = 100
TYPE_VOCAB = 2
MAX_POS = 16
HIDDEN = 32
HEADS = 4
HEAD_DIM = HIDDEN // HEADS          # 8
INTERMEDIATE = 64
LAYERS = 2
LN_EPS = 1e-12

B = 2
S = 8
BS = B * S
NUM_ENC = 2                          # context encoder + candidate encoder
SCALE_Q = 1.0 / float(HEAD_DIM) ** 0.5


# ----------------------------- in-kernel helpers ------------------------------
def _ln(x, g, b):
    mean = jnp.mean(x, axis=-1, keepdims=True)
    var = jnp.mean((x - mean) ** 2, axis=-1, keepdims=True)
    return (x - mean) * jax.lax.rsqrt(var + LN_EPS) * g + b


def _gelu(x):
    # exact (erf-based) GELU, matching HF BERT's default "gelu"
    return 0.5 * x * (1.0 + jax.lax.erf(x * 0.7071067811865476))


# ------------------------- fused per-(encoder, layer) kernel -------------------
def _encoder_layer_kernel(x_ref, bias_ref, emb_g_ref, emb_b_ref,
                          wqkv_ref, bqkv_ref, wo_ref, bo_ref,
                          ln1g_ref, ln1b_ref, w1_ref, b1_ref, w2_ref, b2_ref,
                          ln2g_ref, ln2b_ref,
                          out_ref, h_scratch):
    l = pl.program_id(1)

    # layer 0: embedding layer-norm initializes the resident hidden state.
    @pl.when(l == 0)
    def _():
        h_scratch[...] = _ln(x_ref[0], emb_g_ref[0], emb_b_ref[0])

    h = h_scratch[...]                                                  # (BS, H) f32

    # ---- fused QKV projection: one bf16 MXU GEMM, f32 accumulation ----
    # (attention scale already folded into the Q columns of wqkv/bqkv)
    qkv = jnp.dot(h.astype(jnp.bfloat16), wqkv_ref[0, 0],
                  preferred_element_type=jnp.float32) + bqkv_ref[0, 0]  # (BS, 3H)

    bias = bias_ref[0][:, None, :]                                      # (B, 1, S)

    # ---- multi-head self-attention, batched over B via 3-D einsums ----
    # TODO(synk): at real dims (HEAD_DIM=64) group >=2 heads (or grid over heads) so
    #             the sliced/contracted lane dim is >=128 instead of 8-lane slices.
    ctx_parts = []
    for hd in range(HEADS):
        lo = hd * HEAD_DIM
        q = qkv[:, lo:lo + HEAD_DIM].reshape(B, S, HEAD_DIM)
        k = qkv[:, HIDDEN + lo:HIDDEN + lo + HEAD_DIM].reshape(B, S, HEAD_DIM)
        v = qkv[:, 2 * HIDDEN + lo:2 * HIDDEN + lo + HEAD_DIM].reshape(B, S, HEAD_DIM)
        s = jnp.einsum("bqd,bkd->bqk", q.astype(jnp.bfloat16), k.astype(jnp.bfloat16),
                       preferred_element_type=jnp.float32) + bias       # (B, S, S) f32
        m = jnp.max(s, axis=-1, keepdims=True)
        e = jnp.exp(s - m)
        p = e * pl.reciprocal(jnp.sum(e, axis=-1, keepdims=True), approx=True)
        ctx = jnp.einsum("bqk,bkd->bqd", p.astype(jnp.bfloat16), v.astype(jnp.bfloat16),
                         preferred_element_type=jnp.float32)            # (B, S, Dh)
        ctx_parts.append(ctx.reshape(BS, HEAD_DIM))

    # head merge via lane concat, then a single output-projection GEMM (no scratch).
    ctx_all = jnp.concatenate(ctx_parts, axis=-1)                       # (BS, H) f32
    attn_out = jnp.dot(ctx_all.astype(jnp.bfloat16), wo_ref[0, 0],
                       preferred_element_type=jnp.float32) + bo_ref[0, 0]

    h1 = _ln(attn_out + h, ln1g_ref[0, 0], ln1b_ref[0, 0])

    # ---- feed-forward (bf16 GEMMs, f32 accumulation; GELU in f32) ----
    ffn = _gelu(jnp.dot(h1.astype(jnp.bfloat16), w1_ref[0, 0],
                        preferred_element_type=jnp.float32) + b1_ref[0, 0])
    ffn = jnp.dot(ffn.astype(jnp.bfloat16), w2_ref[0, 0],
                  preferred_element_type=jnp.float32) + b2_ref[0, 0]
    h_new = _ln(ffn + h1, ln2g_ref[0, 0], ln2b_ref[0, 0])
    h_scratch[...] = h_new

    # last layer: single consolidated CLS store (rows 0, S, 2S, ... of h_new).
    @pl.when(l == LAYERS - 1)
    def _():
        cls = jnp.concatenate([h_new[b * S:b * S + 1, :] for b in range(B)], axis=0)
        out_ref[0, :, :] = cls


# ----------------------------- pallas_call wrapper -----------------------------
def _enc_spec(shape):
    """Array indexed only by the encoder axis (layer-invariant)."""
    n = len(shape) - 1
    return pl.BlockSpec((1,) + tuple(shape[1:]), lambda e, l, _n=n: (e,) + (0,) * _n)


def _layer_spec(shape):
    """Array indexed by (encoder, layer): streamed per layer (double-buffered)."""
    n = len(shape) - 2
    return pl.BlockSpec((1, 1) + tuple(shape[2:]), lambda e, l, _n=n: (e, l) + (0,) * _n)


def _fused_encoders(sp, x, bias):
    """x: (2, B*S, H) pre-gathered embedding sums; bias: (2, B, S) additive mask."""
    per_enc = [x, bias, sp["emb_ln_g"], sp["emb_ln_b"]]
    per_layer = [sp["wqkv"], sp["bqkv"], sp["wo"], sp["bo"],
                 sp["ln1_g"], sp["ln1_b"], sp["w1"], sp["b1"],
                 sp["w2"], sp["b2"], sp["ln2_g"], sp["ln2_b"]]
    in_specs = ([_enc_spec(a.shape) for a in per_enc]
                + [_layer_spec(a.shape) for a in per_layer])
    return pl.pallas_call(
        _encoder_layer_kernel,
        out_shape=jax.ShapeDtypeStruct((NUM_ENC, B, HIDDEN), jnp.float32),
        grid=(NUM_ENC, LAYERS),
        in_specs=in_specs,
        out_specs=pl.BlockSpec((1, B, HIDDEN), lambda e, l: (e, 0, 0)),
        scratch_shapes=[pltpu.VMEM((BS, HIDDEN), jnp.float32)],   # resident hidden state
        compiler_params=pltpu.CompilerParams(
            # TODO(synk): use pltpu.CORE_PARALLEL on the encoder axis to split the two
            #             encoders across v7x's 2 TensorCores, and set vmem_limit_bytes
            #             (2x per-layer bf16 weights + activations) once real BERT dims
            #             land; at toy dims the defaults are fine.
            dimension_semantics=("parallel", "arbitrary")),
    )(*per_enc, *per_layer)


# ----------------------------- bi-encoder forward ------------------------------
def biencoder_forward(sp, token_idx_ctxt, segment_idx_ctxt, mask_ctxt,
                      token_idx_cands, segment_idx_cands, mask_cands):
    # Embedding-table gathers stay in plain JAX (glue, not a hot path at this size).
    # TODO(synk): fuse the gather+sum into the kernel (scalar-prefetch ids + pl.Element
    #             row gather) once S is large enough for the HBM round trip to matter.
    def emb_sum(e, tok, seg):
        we = jnp.take(sp["word_emb"][e], tok, axis=0)                   # (B, S, H)
        pe = sp["pos_emb"][e][: tok.shape[1]][None, :, :]               # (1, S, H)
        te = jnp.take(sp["type_emb"][e], seg, axis=0)                   # (B, S, H)
        return (we + pe + te).reshape(tok.shape[0] * tok.shape[1], HIDDEN)

    x = jnp.stack([emb_sum(0, token_idx_ctxt, segment_idx_ctxt),
                   emb_sum(1, token_idx_cands, segment_idx_cands)])     # (2, BS, H)
    bias = jnp.stack([(1.0 - mask_ctxt.astype(jnp.float32)) * -10000.0,
                      (1.0 - mask_cands.astype(jnp.float32)) * -10000.0])  # (2, B, S)

    out = _fused_encoders(sp, x, bias)                                  # (2, B, H)
    return out[0], out[1]


# ----------------------------- parameter init ----------------------------------
def _normal(key, shape, scale=0.02):
    return (scale * jax.random.normal(key, shape)).astype(jnp.float32)


def _init_encoder_params(key):
    keys = iter(jax.random.split(key, 3 + 6 * LAYERS))
    params = {
        "word_emb": _normal(next(keys), (VOCAB, HIDDEN)),
        "pos_emb": _normal(next(keys), (MAX_POS, HIDDEN)),
        "type_emb": _normal(next(keys), (TYPE_VOCAB, HIDDEN)),
        "emb_ln_g": jnp.ones((1, HIDDEN), jnp.float32),
        "emb_ln_b": jnp.zeros((1, HIDDEN), jnp.float32),
        "layers": [],
    }
    for _ in range(LAYERS):
        params["layers"].append({
            "wq": _normal(next(keys), (HIDDEN, HIDDEN)),
            "bq": jnp.zeros((1, HIDDEN), jnp.float32),
            "wk": _normal(next(keys), (HIDDEN, HIDDEN)),
            "bk": jnp.zeros((1, HIDDEN), jnp.float32),
            "wv": _normal(next(keys), (HIDDEN, HIDDEN)),
            "bv": jnp.zeros((1, HIDDEN), jnp.float32),
            "wo": _normal(next(keys), (HIDDEN, HIDDEN)),
            "bo": jnp.zeros((1, HIDDEN), jnp.float32),
            "ln1_g": jnp.ones((1, HIDDEN), jnp.float32),
            "ln1_b": jnp.zeros((1, HIDDEN), jnp.float32),
            "w1": _normal(next(keys), (HIDDEN, INTERMEDIATE)),
            "b1": jnp.zeros((1, INTERMEDIATE), jnp.float32),
            "w2": _normal(next(keys), (INTERMEDIATE, HIDDEN)),
            "b2": jnp.zeros((1, HIDDEN), jnp.float32),
            "ln2_g": jnp.ones((1, HIDDEN), jnp.float32),
            "ln2_b": jnp.zeros((1, HIDDEN), jnp.float32),
        })
    return params


def _stack_encoder_params(p_ctxt, p_cand):
    """Stack the two encoders/layers; fuse QKV, fold the attention scale into the Q
    columns, and store GEMM weights in bf16 (f32 accumulation happens on the MXU)."""
    def per_enc(p):
        def stack_layers(fn, dtype=jnp.float32):
            return jnp.stack([fn(lp) for lp in p["layers"]]).astype(dtype)
        d = {
            "word_emb": p["word_emb"], "pos_emb": p["pos_emb"], "type_emb": p["type_emb"],
            "emb_ln_g": p["emb_ln_g"], "emb_ln_b": p["emb_ln_b"],
            "wqkv": stack_layers(lambda lp: jnp.concatenate(
                [lp["wq"] * SCALE_Q, lp["wk"], lp["wv"]], axis=1), jnp.bfloat16),
            "bqkv": stack_layers(lambda lp: jnp.concatenate(
                [lp["bq"] * SCALE_Q, lp["bk"], lp["bv"]], axis=1)),
            "wo": stack_layers(lambda lp: lp["wo"], jnp.bfloat16),
            "w1": stack_layers(lambda lp: lp["w1"], jnp.bfloat16),
            "w2": stack_layers(lambda lp: lp["w2"], jnp.bfloat16),
        }
        for name in ("bo", "ln1_g", "ln1_b", "b1", "b2", "ln2_g", "ln2_b"):
            d[name] = stack_layers(lambda lp, n=name: lp[n])
        return d
    dc, dd = per_enc(p_ctxt), per_enc(p_cand)
    return jax.tree_util.tree_map(lambda a, b: jnp.stack([a, b]), dc, dd)


# ---------------- pure-JAX f32 reference (independent of the stacking) ----------
def _reference_encoder(p, token_ids, segment_ids, mask):
    def ln(x, g, b):
        mu = x.mean(-1, keepdims=True)
        var = ((x - mu) ** 2).mean(-1, keepdims=True)
        return (x - mu) * jax.lax.rsqrt(var + LN_EPS) * g + b

    bsz, seq = token_ids.shape
    we = jnp.take(p["word_emb"], token_ids, axis=0)
    pe = p["pos_emb"][:seq][None]
    te = jnp.take(p["type_emb"], segment_ids, axis=0)
    h = ln(we + pe + te, p["emb_ln_g"], p["emb_ln_b"])                  # (B, S, H)
    bias = ((1.0 - mask.astype(jnp.float32)) * -10000.0)[:, None, None, :]

    def heads(t):
        return t.reshape(bsz, seq, HEADS, HEAD_DIM).transpose(0, 2, 1, 3)

    for lp in p["layers"]:
        q = heads(h @ lp["wq"] + lp["bq"])
        k = heads(h @ lp["wk"] + lp["bk"])
        v = heads(h @ lp["wv"] + lp["bv"])
        s = jnp.einsum("bhqd,bhkd->bhqk", q, k) / jnp.sqrt(1.0 * HEAD_DIM) + bias
        pr = jax.nn.softmax(s, axis=-1)
        ctx = jnp.einsum("bhqk,bhkd->bhqd", pr, v).transpose(0, 2, 1, 3)
        ctx = ctx.reshape(bsz, seq, HIDDEN)
        attn_out = ctx @ lp["wo"] + lp["bo"]
        h1 = ln(attn_out + h, lp["ln1_g"], lp["ln1_b"])
        ffn = h1 @ lp["w1"] + lp["b1"]
        ffn = 0.5 * ffn * (1.0 + jax.lax.erf(ffn * 0.7071067811865476))
        ffn = ffn @ lp["w2"] + lp["b2"]
        h = ln(ffn + h1, lp["ln2_g"], lp["ln2_b"])
    return h[:, 0, :]


# ------------------------------------ main --------------------------------------
if __name__ == "__main__":
    root = jax.random.PRNGKey(0)
    k_ctxt, k_cand, k_tok_c, k_tok_e, k_seg = jax.random.split(root, 5)

    p_ctxt = _init_encoder_params(k_ctxt)
    p_cand = _init_encoder_params(k_cand)
    stacked = _stack_encoder_params(p_ctxt, p_cand)

    token_idx_ctxt = jax.random.randint(k_tok_c, (B, S), 0, VOCAB, dtype=jnp.int32)
    token_idx_cands = jax.random.randint(k_tok_e, (B, S), 0, VOCAB, dtype=jnp.int32)
    segment_idx_ctxt = jnp.zeros((B, S), jnp.int32)
    segment_idx_cands = jax.random.randint(k_seg, (B, S), 0, TYPE_VOCAB, dtype=jnp.int32)
    mask_ctxt = jnp.ones((B, S), jnp.float32)
    mask_cands = jnp.concatenate(
        [jnp.ones((B, S - 2), jnp.float32), jnp.zeros((B, 2), jnp.float32)], axis=1)

    fwd = jax.jit(biencoder_forward)
    embedding_ctxt, embedding_cands = fwd(
        stacked, token_idx_ctxt, segment_idx_ctxt, mask_ctxt,
        token_idx_cands, segment_idx_cands, mask_cands)
    jax.block_until_ready((embedding_ctxt, embedding_cands))

    # correctness vs. an independent pure-f32 JAX reference built from the raw
    # (unstacked, unscaled, separate-QKV) parameters.
    ref_ctxt = _reference_encoder(p_ctxt, token_idx_ctxt, segment_idx_ctxt, mask_ctxt)
    ref_cands = _reference_encoder(p_cand, token_idx_cands, segment_idx_cands, mask_cands)

    assert embedding_ctxt.shape == (B, HIDDEN)
    assert embedding_cands.shape == (B, HIDDEN)
    assert jnp.all(jnp.isfinite(embedding_ctxt)) and jnp.all(jnp.isfinite(embedding_cands))
    # bf16 GEMM operands (f32 accumulation) vs. full-f32 reference -> loosened tolerance.
    assert jnp.allclose(embedding_ctxt, ref_ctxt, atol=5e-2, rtol=5e-2)
    assert jnp.allclose(embedding_cands, ref_cands, atol=5e-2, rtol=5e-2)
    print("KERNEL_OK")
</pallas_src>

<mosaic_0001>
module attributes {stable_mosaic.version = 11 : i64} {
  func.func @_encoder_layer_kernel(%arg0: i32, %arg1: i32, %arg2: memref<1x16x32xf32, #tpu.memory_space<vmem>>, %arg3: memref<1x2x8xf32, #tpu.memory_space<vmem>>, %arg4: memref<1x1x32xf32, #tpu.memory_space<vmem>>, %arg5: memref<1x1x32xf32, #tpu.memory_space<vmem>>, %arg6: memref<1x1x32x96xbf16, #tpu.memory_space<vmem>>, %arg7: memref<1x1x1x96xf32, #tpu.memory_space<vmem>>, %arg8: memref<1x1x32x32xbf16, #tpu.memory_space<vmem>>, %arg9: memref<1x1x1x32xf32, #tpu.memory_space<vmem>>, %arg10: memref<1x1x1x32xf32, #tpu.memory_space<vmem>>, %arg11: memref<1x1x1x32xf32, #tpu.memory_space<vmem>>, %arg12: memref<1x1x32x64xbf16, #tpu.memory_space<vmem>>, %arg13: memref<1x1x1x64xf32, #tpu.memory_space<vmem>>, %arg14: memref<1x1x64x32xbf16, #tpu.memory_space<vmem>>, %arg15: memref<1x1x1x32xf32, #tpu.memory_space<vmem>>, %arg16: memref<1x1x1x32xf32, #tpu.memory_space<vmem>>, %arg17: memref<1x1x1x32xf32, #tpu.memory_space<vmem>>, %arg18: memref<1x2x32xf32, #tpu.memory_space<vmem>>, %arg19: memref<16x32xf32, #tpu.memory_space<vmem>>) attributes {dimension_semantics = [#tpu.dimension_semantics<parallel>, #tpu.dimension_semantics<arbitrary>], iteration_bounds = array<i64: 2, 2>, scalar_prefetch = 0 : i64, scratch_operands = 1 : i64, tpu.core_type = #tpu.core_type<tc>, window_params = [{transform_indices = @transform_0, window_bounds = array<i64: 1, 16, 32>}, {transform_indices = @transform_1, window_bounds = array<i64: 1, 2, 8>}, {transform_indices = @transform_2, window_bounds = array<i64: 1, 1, 32>}, {transform_indices = @transform_3, window_bounds = array<i64: 1, 1, 32>}, {transform_indices = @transform_4, window_bounds = array<i64: 1, 1, 32, 96>}, {transform_indices = @transform_5, window_bounds = array<i64: 1, 1, 1, 96>}, {transform_indices = @transform_6, window_bounds = array<i64: 1, 1, 32, 32>}, {transform_indices = @transform_7, window_bounds = array<i64: 1, 1, 1, 32>}, {transform_indices = @transform_8, window_bounds = array<i64: 1, 1, 1, 32>}, {transform_indices = @transform_9, window_bounds = array<i64: 1, 1, 1, 32>}, {transform_indices = @transform_10, window_bounds = array<i64: 1, 1, 32, 64>}, {transform_indices = @transform_11, window_bounds = array<i64: 1, 1, 1, 64>}, {transform_indices = @transform_12, window_bounds = array<i64: 1, 1, 64, 32>}, {transform_indices = @transform_13, window_bounds = array<i64: 1, 1, 1, 32>}, {transform_indices = @transform_14, window_bounds = array<i64: 1, 1, 1, 32>}, {transform_indices = @transform_15, window_bounds = array<i64: 1, 1, 1, 32>}, {transform_indices = @transform_16, window_bounds = array<i64: 1, 2, 32>}]} {
    %c0_i32 = arith.constant 0 : i32
    %0 = arith.cmpi eq, %arg1, %c0_i32 : i32
    %1 = arith.extui %0 : i1 to i32
    %c0_i32_0 = arith.constant 0 : i32
    %2 = arith.cmpi ne, %1, %c0_i32_0 : i32
    scf.if %2 {
      %c0_88 = arith.constant 0 : index
      %c0_89 = arith.constant 0 : index
      %c0_90 = arith.constant 0 : index
      %206 = vector.load %arg2[%c0_88, %c0_89, %c0_90] : memref<1x16x32xf32, #tpu.memory_space<vmem>>, vector<1x16x32xf32>
      %207 = vector.shape_cast %206 : vector<1x16x32xf32> to vector<16x32xf32>
      %c0_91 = arith.constant 0 : index
      %c0_92 = arith.constant 0 : index
      %c0_93 = arith.constant 0 : index
      %208 = vector.load %arg4[%c0_91, %c0_92, %c0_93] : memref<1x1x32xf32, #tpu.memory_space<vmem>>, vector<1x1x32xf32>
      %209 = vector.shape_cast %208 : vector<1x1x32xf32> to vector<1x32xf32>
      %c0_94 = arith.constant 0 : index
      %c0_95 = arith.constant 0 : index
      %c0_96 = arith.constant 0 : index
      %210 = vector.load %arg5[%c0_94, %c0_95, %c0_96] : memref<1x1x32xf32, #tpu.memory_space<vmem>>, vector<1x1x32xf32>
      %211 = vector.shape_cast %210 : vector<1x1x32xf32> to vector<1x32xf32>
      %cst_97 = arith.constant dense<0.000000e+00> : vector<16xf32>
      %212 = vector.multi_reduction <add>, %207, %cst_97 [1] : vector<16x32xf32> to vector<16xf32>
      %213 = vector.shape_cast %212 : vector<16xf32> to vector<16x1xf32>
      %cst_98 = arith.constant 3.200000e+01 : f32
      %214 = vector.broadcast %cst_98 : f32 to vector<16x1xf32>
      %215 = arith.divf %213, %214 : vector<16x1xf32>
      %216 = vector.broadcast %215 : vector<16x1xf32> to vector<16x32xf32>
      %217 = arith.subf %207, %216 : vector<16x32xf32>
      %218 = arith.mulf %217, %217 : vector<16x32xf32>
      %cst_99 = arith.constant dense<0.000000e+00> : vector<16xf32>
      %219 = vector.multi_reduction <add>, %218, %cst_99 [1] : vector<16x32xf32> to vector<16xf32>
      %220 = vector.shape_cast %219 : vector<16xf32> to vector<16x1xf32>
      %cst_100 = arith.constant 3.200000e+01 : f32
      %221 = vector.broadcast %cst_100 : f32 to vector<16x1xf32>
      %222 = arith.divf %220, %221 : vector<16x1xf32>
      %223 = vector.broadcast %215 : vector<16x1xf32> to vector<16x32xf32>
      %224 = arith.subf %207, %223 : vector<16x32xf32>
      %cst_101 = arith.constant 9.99999996E-13 : f32
      %225 = vector.broadcast %cst_101 : f32 to vector<16x1xf32>
      %226 = arith.addf %222, %225 : vector<16x1xf32>
      %227 = math.rsqrt %226 : vector<16x1xf32>
      %228 = vector.broadcast %227 : vector<16x1xf32> to vector<16x32xf32>
      %229 = arith.mulf %224, %228 : vector<16x32xf32>
      %230 = vector.broadcast %209 : vector<1x32xf32> to vector<16x32xf32>
      %231 = arith.mulf %229, %230 : vector<16x32xf32>
      %232 = vector.broadcast %211 : vector<1x32xf32> to vector<16x32xf32>
      %233 = arith.addf %231, %232 : vector<16x32xf32>
      %c0_102 = arith.constant 0 : index
      %c0_103 = arith.constant 0 : index
      %234 = vector.load %arg19[%c0_102, %c0_103] : memref<16x32xf32, #tpu.memory_space<vmem>>, vector<16x32xf32>
      tpu.vector_store %arg19[%c0_102, %c0_103], %233 {strides = array<i32>} : memref<16x32xf32, #tpu.memory_space<vmem>>, vector<16x32xf32>,
    } else {
    }
    %c0 = arith.constant 0 : index
    %c0_1 = arith.constant 0 : index
    %3 = vector.load %arg19[%c0, %c0_1] : memref<16x32xf32, #tpu.memory_space<vmem>>, vector<16x32xf32>
    %4 = arith.truncf %3 : vector<16x32xf32> to vector<16x32xbf16>
    %c0_2 = arith.constant 0 : index
    %c0_3 = arith.constant 0 : index
    %c0_4 = arith.constant 0 : index
    %c0_5 = arith.constant 0 : index
    %5 = vector.load %arg6[%c0_2, %c0_3, %c0_4, %c0_5] : memref<1x1x32x96xbf16, #tpu.memory_space<vmem>>, vector<1x1x32x96xbf16>
    %6 = vector.shape_cast %5 : vector<1x1x32x96xbf16> to vector<32x96xbf16>
    %cst = arith.constant dense<0.000000e+00> : vector<16x96xf32>
    %7 = tpu.matmul %4, %6, %cst {dimension_numbers = #tpu.dot_dimension_numbers<[1], [0], [0], [1], [0, 0, 1, 1], [], []>} : vector<16x32xbf16>, vector<32x96xbf16>, vector<16x96xf32> -> vector<16x96xf32>
    %c0_6 = arith.constant 0 : index
    %c0_7 = arith.constant 0 : index
    %c0_8 = arith.constant 0 : index
    %c0_9 = arith.constant 0 : index
    %8 = vector.load %arg7[%c0_6, %c0_7, %c0_8, %c0_9] : memref<1x1x1x96xf32, #tpu.memory_space<vmem>>, vector<1x1x1x96xf32>
    %9 = vector.shape_cast %8 : vector<1x1x1x96xf32> to vector<1x96xf32>
    %10 = vector.broadcast %9 : vector<1x96xf32> to vector<16x96xf32>
    %11 = arith.addf %7, %10 : vector<16x96xf32>
    %c0_10 = arith.constant 0 : index
    %c0_11 = arith.constant 0 : index
    %c0_12 = arith.constant 0 : index
    %12 = vector.load %arg3[%c0_10, %c0_11, %c0_12] : memref<1x2x8xf32, #tpu.memory_space<vmem>>, vector<1x2x8xf32>
    %13 = vector.shape_cast %12 : vector<1x2x8xf32> to vector<2x8xf32>
    %14 = vector.shape_cast %13 : vector<2x8xf32> to vector<2x1x8xf32>
    %15 = vector.extract_strided_slice %11 {offsets = [0, 0], sizes = [16, 8], strides = [1, 1]} : vector<16x96xf32> to vector<16x8xf32>
    %16 = vector.shape_cast %15 : vector<16x8xf32> to vector<2x8x8xf32>
    %17 = vector.extract_strided_slice %11 {offsets = [0, 32], sizes = [16, 8], strides = [1, 1]} : vector<16x96xf32> to vector<16x8xf32>
    %18 = vector.shape_cast %17 : vector<16x8xf32> to vector<2x8x8xf32>
    %19 = vector.extract_strided_slice %11 {offsets = [0, 64], sizes = [16, 8], strides = [1, 1]} : vector<16x96xf32> to vector<16x8xf32>
    %20 = vector.shape_cast %19 : vector<16x8xf32> to vector<2x8x8xf32>
    %21 = arith.truncf %16 : vector<2x8x8xf32> to vector<2x8x8xbf16>
    %22 = arith.truncf %18 : vector<2x8x8xf32> to vector<2x8x8xbf16>
    "tpu.trace_start"() <{level = 10 : i32, message = "bqd,bkd->bqk"}> : () -> ()
    %cst_13 = arith.constant dense<0.000000e+00> : vector<2x8x8xf32>
    %23 = tpu.matmul %21, %22, %cst_13 {dimension_numbers = #tpu.dot_dimension_numbers<[2], [2], [1], [1], [0, 0, 0, 1, 1, 1], [0], [0]>} : vector<2x8x8xbf16>, vector<2x8x8xbf16>, vector<2x8x8xf32> -> vector<2x8x8xf32>
    "tpu.trace_stop"() : () -> ()
    %24 = vector.broadcast %14 : vector<2x1x8xf32> to vector<2x8x8xf32>
    %25 = arith.addf %23, %24 : vector<2x8x8xf32>
    %cst_14 = arith.constant dense<0xFF800000> : vector<2x8xf32>
    %26 = vector.multi_reduction <maximumf>, %25, %cst_14 [2] : vector<2x8x8xf32> to vector<2x8xf32>
    %27 = vector.shape_cast %26 : vector<2x8xf32> to vector<2x8x1xf32>
    %28 = vector.broadcast %27 : vector<2x8x1xf32> to vector<2x8x8xf32>
    %29 = arith.subf %25, %28 : vector<2x8x8xf32>
    %30 = math.exp %29 : vector<2x8x8xf32>
    %cst_15 = arith.constant dense<0.000000e+00> : vector<2x8xf32>
    %31 = vector.multi_reduction <add>, %30, %cst_15 [2] : vector<2x8x8xf32> to vector<2x8xf32>
    %32 = vector.shape_cast %31 : vector<2x8xf32> to vector<2x8x1xf32>
    %33 = tpu.reciprocal %32 {approx = true} : vector<2x8x1xf32> -> vector<2x8x1xf32>
    %34 = vector.broadcast %33 : vector<2x8x1xf32> to vector<2x8x8xf32>
    %35 = arith.mulf %30, %34 : vector<2x8x8xf32>
    %36 = arith.truncf %35 : vector<2x8x8xf32> to vector<2x8x8xbf16>
    %37 = arith.truncf %20 : vector<2x8x8xf32> to vector<2x8x8xbf16>
    "tpu.trace_start"() <{level = 10 : i32, message = "bqk,bkd->bqd"}> : () -> ()
    %cst_16 = arith.constant dense<0.000000e+00> : vector<2x8x8xf32>
    %38 = tpu.matmul %36, %37, %cst_16 {dimension_numbers = #tpu.dot_dimension_numbers<[2], [1], [1], [2], [0, 0, 0, 1, 1, 2], [0], [0]>} : vector<2x8x8xbf16>, vector<2x8x8xbf16>, vector<2x8x8xf32> -> vector<2x8x8xf32>
    "tpu.trace_stop"() : () -> ()
    %39 = vector.shape_cast %38 : vector<2x8x8xf32> to vector<16x8xf32>
    %40 = vector.extract_strided_slice %11 {offsets = [0, 8], sizes = [16, 8], strides = [1, 1]} : vector<16x96xf32> to vector<16x8xf32>
    %41 = vector.shape_cast %40 : vector<16x8xf32> to vector<2x8x8xf32>
    %42 = vector.extract_strided_slice %11 {offsets = [0, 40], sizes = [16, 8], strides = [1, 1]} : vector<16x96xf32> to vector<16x8xf32>
    %43 = vector.shape_cast %42 : vector<16x8xf32> to vector<2x8x8xf32>
    %44 = vector.extract_strided_slice %11 {offsets = [0, 72], sizes = [16, 8], strides = [1, 1]} : vector<16x96xf32> to vector<16x8xf32>
    %45 = vector.shape_cast %44 : vector<16x8xf32> to vector<2x8x8xf32>
    %46 = arith.truncf %41 : vector<2x8x8xf32> to vector<2x8x8xbf16>
    %47 = arith.truncf %43 : vector<2x8x8xf32> to vector<2x8x8xbf16>
    "tpu.trace_start"() <{level = 10 : i32, message = "bqd,bkd->bqk"}> : () -> ()
    %cst_17 = arith.constant dense<0.000000e+00> : vector<2x8x8xf32>
    %48 = tpu.matmul %46, %47, %cst_17 {dimension_numbers = #tpu.dot_dimension_numbers<[2], [2], [1], [1], [0, 0, 0, 1, 1, 1], [0], [0]>} : vector<2x8x8xbf16>, vector<2x8x8xbf16>, vector<2x8x8xf32> -> vector<2x8x8xf32>
    "tpu.trace_stop"() : () -> ()
    %49 = vector.broadcast %14 : vector<2x1x8xf32> to vector<2x8x8xf32>
    %50 = arith.addf %48, %49 : vector<2x8x8xf32>
    %cst_18 = arith.constant dense<0xFF800000> : vector<2x8xf32>
    %51 = vector.multi_reduction <maximumf>, %50, %cst_18 [2] : vector<2x8x8xf32> to vector<2x8xf32>
    %52 = vector.shape_cast %51 : vector<2x8xf32> to vector<2x8x1xf32>
    %53 = vector.broadcast %52 : vector<2x8x1xf32> to vector<2x8x8xf32>
    %54 = arith.subf %50, %53 : vector<2x8x8xf32>
    %55 = math.exp %54 : vector<2x8x8xf32>
    %cst_19 = arith.constant dense<0.000000e+00> : vector<2x8xf32>
    %56 = vector.multi_reduction <add>, %55, %cst_19 [2] : vector<2x8x8xf32> to vector<2x8xf32>
    %57 = vector.shape_cast %56 : vector<2x8xf32> to vector<2x8x1xf32>
    %58 = tpu.reciprocal %57 {approx = true} : vector<2x8x1xf32> -> vector<2x8x1xf32>
    %59 = vector.broadcast %58 : vector<2x8x1xf32> to vector<2x8x8xf32>
    %60 = arith.mulf %55, %59 : vector<2x8x8xf32>
    %61 = arith.truncf %60 : vector<2x8x8xf32> to vector<2x8x8xbf16>
    %62 = arith.truncf %45 : vector<2x8x8xf32> to vector<2x8x8xbf16>
    "tpu.trace_start"() <{level = 10 : i32, message = "bqk,bkd->bqd"}> : () -> ()
    %cst_20 = arith.constant dense<0.000000e+00> : vector<2x8x8xf32>
    %63 = tpu.matmul %61, %62, %cst_20 {dimension_numbers = #tpu.dot_dimension_numbers<[2], [1], [1], [2], [0, 0, 0, 1, 1, 2], [0], [0]>} : vector<2x8x8xbf16>, vector<2x8x8xbf16>, vector<2x8x8xf32> -> vector<2x8x8xf32>
    "tpu.trace_stop"() : () -> ()
    %64 = vector.shape_cast %63 : vector<2x8x8xf32> to vector<16x8xf32>
    %65 = vector.extract_strided_slice %11 {offsets = [0, 16], sizes = [16, 8], strides = [1, 1]} : vector<16x96xf32> to vector<16x8xf32>
    %66 = vector.shape_cast %65 : vector<16x8xf32> to vector<2x8x8xf32>
    %67 = vector.extract_strided_slice %11 {offsets = [0, 48], sizes = [16, 8], strides = [1, 1]} : vector<16x96xf32> to vector<16x8xf32>
    %68 = vector.shape_cast %67 : vector<16x8xf32> to vector<2x8x8xf32>
    %69 = vector.extract_strided_slice %11 {offsets = [0, 80], sizes = [16, 8], strides = [1, 1]} : vector<16x96xf32> to vector<16x8xf32>
    %70 = vector.shape_cast %69 : vector<16x8xf32> to vector<2x8x8xf32>
    %71 = arith.truncf %66 : vector<2x8x8xf32> to vector<2x8x8xbf16>
    %72 = arith.truncf %68 : vector<2x8x8xf32> to vector<2x8x8xbf16>
    "tpu.trace_start"() <{level = 10 : i32, message = "bqd,bkd->bqk"}> : () -> ()
    %cst_21 = arith.constant dense<0.000000e+00> : vector<2x8x8xf32>
    %73 = tpu.matmul %71, %72, %cst_21 {dimension_numbers = #tpu.dot_dimension_numbers<[2], [2], [1], [1], [0, 0, 0, 1, 1, 1], [0], [0]>} : vector<2x8x8xbf16>, vector<2x8x8xbf16>, vector<2x8x8xf32> -> vector<2x8x8xf32>
    "tpu.trace_stop"() : () -> ()
    %74 = vector.broadcast %14 : vector<2x1x8xf32> to vector<2x8x8xf32>
    %75 = arith.addf %73, %74 : vector<2x8x8xf32>
    %cst_22 = arith.constant dense<0xFF800000> : vector<2x8xf32>
    %76 = vector.multi_reduction <maximumf>, %75, %cst_22 [2] : vector<2x8x8xf32> to vector<2x8xf32>
    %77 = vector.shape_cast %76 : vector<2x8xf32> to vector<2x8x1xf32>
    %78 = vector.broadcast %77 : vector<2x8x1xf32> to vector<2x8x8xf32>
    %79 = arith.subf %75, %78 : vector<2x8x8xf32>
    %80 = math.exp %79 : vector<2x8x8xf32>
    %cst_23 = arith.constant dense<0.000000e+00> : vector<2x8xf32>
    %81 = vector.multi_reduction <add>, %80, %cst_23 [2] : vector<2x8x8xf32> to vector<2x8xf32>
    %82 = vector.shape_cast %81 : vector<2x8xf32> to vector<2x8x1xf32>
    %83 = tpu.reciprocal %82 {approx = true} : vector<2x8x1xf32> -> vector<2x8x1xf32>
    %84 = vector.broadcast %83 : vector<2x8x1xf32> to vector<2x8x8xf32>
    %85 = arith.mulf %80, %84 : vector<2x8x8xf32>
    %86 = arith.truncf %85 : vector<2x8x8xf32> to vector<2x8x8xbf16>
    %87 = arith.truncf %70 : vector<2x8x8xf32> to vector<2x8x8xbf16>
    "tpu.trace_start"() <{level = 10 : i32, message = "bqk,bkd->bqd"}> : () -> ()
    %cst_24 = arith.constant dense<0.000000e+00> : vector<2x8x8xf32>
    %88 = tpu.matmul %86, %87, %cst_24 {dimension_numbers = #tpu.dot_dimension_numbers<[2], [1], [1], [2], [0, 0, 0, 1, 1, 2], [0], [0]>} : vector<2x8x8xbf16>, vector<2x8x8xbf16>, vector<2x8x8xf32> -> vector<2x8x8xf32>
    "tpu.trace_stop"() : () -> ()
    %89 = vector.shape_cast %88 : vector<2x8x8xf32> to vector<16x8xf32>
    %90 = vector.extract_strided_slice %11 {offsets = [0, 24], sizes = [16, 8], strides = [1, 1]} : vector<16x96xf32> to vector<16x8xf32>
    %91 = vector.shape_cast %90 : vector<16x8xf32> to vector<2x8x8xf32>
    %92 = vector.extract_strided_slice %11 {offsets = [0, 56], sizes = [16, 8], strides = [1, 1]} : vector<16x96xf32> to vector<16x8xf32>
    %93 = vector.shape_cast %92 : vector<16x8xf32> to vector<2x8x8xf32>
    %94 = vector.extract_strided_slice %11 {offsets = [0, 88], sizes = [16, 8], strides = [1, 1]} : vector<16x96xf32> to vector<16x8xf32>
    %95 = vector.shape_cast %94 : vector<16x8xf32> to vector<2x8x8xf32>
    %96 = arith.truncf %91 : vector<2x8x8xf32> to vector<2x8x8xbf16>
    %97 = arith.truncf %93 : vector<2x8x8xf32> to vector<2x8x8xbf16>
    "tpu.trace_start"() <{level = 10 : i32, message = "bqd,bkd->bqk"}> : () -> ()
    %cst_25 = arith.constant dense<0.000000e+00> : vector<2x8x8xf32>
    %98 = tpu.matmul %96, %97, %cst_25 {dimension_numbers = #tpu.dot_dimension_numbers<[2], [2], [1], [1], [0, 0, 0, 1, 1, 1], [0], [0]>} : vector<2x8x8xbf16>, vector<2x8x8xbf16>, vector<2x8x8xf32> -> vector<2x8x8xf32>
    "tpu.trace_stop"() : () -> ()
    %99 = vector.broadcast %14 : vector<2x1x8xf32> to vector<2x8x8xf32>
    %100 = arith.addf %98, %99 : vector<2x8x8xf32>
    %cst_26 = arith.constant dense<0xFF800000> : vector<2x8xf32>
    %101 = vector.multi_reduction <maximumf>, %100, %cst_26 [2] : vector<2x8x8xf32> to vector<2x8xf32>
    %102 = vector.shape_cast %101 : vector<2x8xf32> to vector<2x8x1xf32>
    %103 = vector.broadcast %102 : vector<2x8x1xf32> to vector<2x8x8xf32>
    %104 = arith.subf %100, %103 : vector<2x8x8xf32>
    %105 = math.exp %104 : vector<2x8x8xf32>
    %cst_27 = arith.constant dense<0.000000e+00> : vector<2x8xf32>
    %106 = vector.multi_reduction <add>, %105, %cst_27 [2] : vector<2x8x8xf32> to vector<2x8xf32>
    %107 = vector.shape_cast %106 : vector<2x8xf32> to vector<2x8x1xf32>
    %108 = tpu.reciprocal %107 {approx = true} : vector<2x8x1xf32> -> vector<2x8x1xf32>
    %109 = vector.broadcast %108 : vector<2x8x1xf32> to vector<2x8x8xf32>
    %110 = arith.mulf %105, %109 : vector<2x8x8xf32>
    %111 = arith.truncf %110 : vector<2x8x8xf32> to vector<2x8x8xbf16>
    %112 = arith.truncf %95 : vector<2x8x8xf32> to vector<2x8x8xbf16>
    "tpu.trace_start"() <{level = 10 : i32, message = "bqk,bkd->bqd"}> : () -> ()
    %cst_28 = arith.constant dense<0.000000e+00> : vector<2x8x8xf32>
    %113 = tpu.matmul %111, %112, %cst_28 {dimension_numbers = #tpu.dot_dimension_numbers<[2], [1], [1], [2], [0, 0, 0, 1, 1, 2], [0], [0]>} : vector<2x8x8xbf16>, vector<2x8x8xbf16>, vector<2x8x8xf32> -> vector<2x8x8xf32>
    "tpu.trace_stop"() : () -> ()
    %114 = vector.shape_cast %113 : vector<2x8x8xf32> to vector<16x8xf32>
    %115 = tpu.concatenate %39, %64, %89, %114 in 1 : vector<16x8xf32>, vector<16x8xf32>, vector<16x8xf32>, vector<16x8xf32> -> vector<16x32xf32>
    %116 = arith.truncf %115 : vector<16x32xf32> to vector<16x32xbf16>
    %c0_29 = arith.constant 0 : index
    %c0_30 = arith.constant 0 : index
    %c0_31 = arith.constant 0 : index
    %c0_32 = arith.constant 0 : index
    %117 = vector.load %arg8[%c0_29, %c0_30, %c0_31, %c0_32] : memref<1x1x32x32xbf16, #tpu.memory_space<vmem>>, vector<1x1x32x32xbf16>
    %118 = vector.shape_cast %117 : vector<1x1x32x32xbf16> to vector<32x32xbf16>
    %cst_33 = arith.constant dense<0.000000e+00> : vector<16x32xf32>
    %119 = tpu.matmul %116, %118, %cst_33 {dimension_numbers = #tpu.dot_dimension_numbers<[1], [0], [0], [1], [0, 0, 1, 1], [], []>} : vector<16x32xbf16>, vector<32x32xbf16>, vector<16x32xf32> -> vector<16x32xf32>
    %c0_34 = arith.constant 0 : index
    %c0_35 = arith.constant 0 : index
    %c0_36 = arith.constant 0 : index
    %c0_37 = arith.constant 0 : index
    %120 = vector.load %arg9[%c0_34, %c0_35, %c0_36, %c0_37] : memref<1x1x1x32xf32, #tpu.memory_space<vmem>>, vector<1x1x1x32xf32>
    %121 = vector.shape_cast %120 : vector<1x1x1x32xf32> to vector<1x32xf32>
    %122 = vector.broadcast %121 : vector<1x32xf32> to vector<16x32xf32>
    %123 = arith.addf %119, %122 : vector<16x32xf32>
    %124 = arith.addf %123, %3 : vector<16x32xf32>
    %c0_38 = arith.constant 0 : index
    %c0_39 = arith.constant 0 : index
    %c0_40 = arith.constant 0 : index
    %c0_41 = arith.constant 0 : index
    %125 = vector.load %arg10[%c0_38, %c0_39, %c0_40, %c0_41] : memref<1x1x1x32xf32, #tpu.memory_space<vmem>>, vector<1x1x1x32xf32>
    %126 = vector.shape_cast %125 : vector<1x1x1x32xf32> to vector<1x32xf32>
    %c0_42 = arith.constant 0 : index
    %c0_43 = arith.constant 0 : index
    %c0_44 = arith.constant 0 : index
    %c0_45 = arith.constant 0 : index
    %127 = vector.load %arg11[%c0_42, %c0_43, %c0_44, %c0_45] : memref<1x1x1x32xf32, #tpu.memory_space<vmem>>, vector<1x1x1x32xf32>
    %128 = vector.shape_cast %127 : vector<1x1x1x32xf32> to vector<1x32xf32>
    %cst_46 = arith.constant dense<0.000000e+00> : vector<16xf32>
    %129 = vector.multi_reduction <add>, %124, %cst_46 [1] : vector<16x32xf32> to vector<16xf32>
    %130 = vector.shape_cast %129 : vector<16xf32> to vector<16x1xf32>
    %cst_47 = arith.constant 3.200000e+01 : f32
    %131 = vector.broadcast %cst_47 : f32 to vector<16x1xf32>
    %132 = arith.divf %130, %131 : vector<16x1xf32>
    %133 = vector.broadcast %132 : vector<16x1xf32> to vector<16x32xf32>
    %134 = arith.subf %124, %133 : vector<16x32xf32>
    %135 = arith.mulf %134, %134 : vector<16x32xf32>
    %cst_48 = arith.constant dense<0.000000e+00> : vector<16xf32>
    %136 = vector.multi_reduction <add>, %135, %cst_48 [1] : vector<16x32xf32> to vector<16xf32>
    %137 = vector.shape_cast %136 : vector<16xf32> to vector<16x1xf32>
    %cst_49 = arith.constant 3.200000e+01 : f32
    %138 = vector.broadcast %cst_49 : f32 to vector<16x1xf32>
    %139 = arith.divf %137, %138 : vector<16x1xf32>
    %140 = vector.broadcast %132 : vector<16x1xf32> to vector<16x32xf32>
    %141 = arith.subf %124, %140 : vector<16x32xf32>
    %cst_50 = arith.constant 9.99999996E-13 : f32
    %142 = vector.broadcast %cst_50 : f32 to vector<16x1xf32>
    %143 = arith.addf %139, %142 : vector<16x1xf32>
    %144 = math.rsqrt %143 : vector<16x1xf32>
    %145 = vector.broadcast %144 : vector<16x1xf32> to vector<16x32xf32>
    %146 = arith.mulf %141, %145 : vector<16x32xf32>
    %147 = vector.broadcast %126 : vector<1x32xf32> to vector<16x32xf32>
    %148 = arith.mulf %146, %147 : vector<16x32xf32>
    %149 = vector.broadcast %128 : vector<1x32xf32> to vector<16x32xf32>
    %150 = arith.addf %148, %149 : vector<16x32xf32>
    %151 = arith.truncf %150 : vector<16x32xf32> to vector<16x32xbf16>
    %c0_51 = arith.constant 0 : index
    %c0_52 = arith.constant 0 : index
    %c0_53 = arith.constant 0 : index
    %c0_54 = arith.constant 0 : index
    %152 = vector.load %arg12[%c0_51, %c0_52, %c0_53, %c0_54] : memref<1x1x32x64xbf16, #tpu.memory_space<vmem>>, vector<1x1x32x64xbf16>
    %153 = vector.shape_cast %152 : vector<1x1x32x64xbf16> to vector<32x64xbf16>
    %cst_55 = arith.constant dense<0.000000e+00> : vector<16x64xf32>
    %154 = tpu.matmul %151, %153, %cst_55 {dimension_numbers = #tpu.dot_dimension_numbers<[1], [0], [0], [1], [0, 0, 1, 1], [], []>} : vector<16x32xbf16>, vector<32x64xbf16>, vector<16x64xf32> -> vector<16x64xf32>
    %c0_56 = arith.constant 0 : index
    %c0_57 = arith.constant 0 : index
    %c0_58 = arith.constant 0 : index
    %c0_59 = arith.constant 0 : index
    %155 = vector.load %arg13[%c0_56, %c0_57, %c0_58, %c0_59] : memref<1x1x1x64xf32, #tpu.memory_space<vmem>>, vector<1x1x1x64xf32>
    %156 = vector.shape_cast %155 : vector<1x1x1x64xf32> to vector<1x64xf32>
    %157 = vector.broadcast %156 : vector<1x64xf32> to vector<16x64xf32>
    %158 = arith.addf %154, %157 : vector<16x64xf32>
    %cst_60 = arith.constant 5.000000e-01 : f32
    %159 = vector.broadcast %cst_60 : f32 to vector<16x64xf32>
    %160 = arith.mulf %159, %158 : vector<16x64xf32>
    %cst_61 = arith.constant 0.707106769 : f32
    %161 = vector.broadcast %cst_61 : f32 to vector<16x64xf32>
    %162 = arith.mulf %158, %161 : vector<16x64xf32>
    %163 = math.erf %162 : vector<16x64xf32>
    %cst_62 = arith.constant 1.000000e+00 : f32
    %164 = vector.broadcast %cst_62 : f32 to vector<16x64xf32>
    %165 = arith.addf %164, %163 : vector<16x64xf32>
    %166 = arith.mulf %160, %165 : vector<16x64xf32>
    %167 = arith.truncf %166 : vector<16x64xf32> to vector<16x64xbf16>
    %c0_63 = arith.constant 0 : index
    %c0_64 = arith.constant 0 : index
    %c0_65 = arith.constant 0 : index
    %c0_66 = arith.constant 0 : index
    %168 = vector.load %arg14[%c0_63, %c0_64, %c0_65, %c0_66] : memref<1x1x64x32xbf16, #tpu.memory_space<vmem>>, vector<1x1x64x32xbf16>
    %169 = vector.shape_cast %168 : vector<1x1x64x32xbf16> to vector<64x32xbf16>
    %cst_67 = arith.constant dense<0.000000e+00> : vector<16x32xf32>
    %170 = tpu.matmul %167, %169, %cst_67 {dimension_numbers = #tpu.dot_dimension_numbers<[1], [0], [0], [1], [0, 0, 1, 1], [], []>} : vector<16x64xbf16>, vector<64x32xbf16>, vector<16x32xf32> -> vector<16x32xf32>
    %c0_68 = arith.constant 0 : index
    %c0_69 = arith.constant 0 : index
    %c0_70 = arith.constant 0 : index
    %c0_71 = arith.constant 0 : index
    %171 = vector.load %arg15[%c0_68, %c0_69, %c0_70, %c0_71] : memref<1x1x1x32xf32, #tpu.memory_space<vmem>>, vector<1x1x1x32xf32>
    %172 = vector.shape_cast %171 : vector<1x1x1x32xf32> to vector<1x32xf32>
    %173 = vector.broadcast %172 : vector<1x32xf32> to vector<16x32xf32>
    %174 = arith.addf %170, %173 : vector<16x32xf32>
    %175 = arith.addf %174, %150 : vector<16x32xf32>
    %c0_72 = arith.constant 0 : index
    %c0_73 = arith.constant 0 : index
    %c0_74 = arith.constant 0 : index
    %c0_75 = arith.constant 0 : index
    %176 = vector.load %arg16[%c0_72, %c0_73, %c0_74, %c0_75] : memref<1x1x1x32xf32, #tpu.memory_space<vmem>>, vector<1x1x1x32xf32>
    %177 = vector.shape_cast %176 : vector<1x1x1x32xf32> to vector<1x32xf32>
    %c0_76 = arith.constant 0 : index
    %c0_77 = arith.constant 0 : index
    %c0_78 = arith.constant 0 : index
    %c0_79 = arith.constant 0 : index
    %178 = vector.load %arg17[%c0_76, %c0_77, %c0_78, %c0_79] : memref<1x1x1x32xf32, #tpu.memory_space<vmem>>, vector<1x1x1x32xf32>
    %179 = vector.shape_cast %178 : vector<1x1x1x32xf32> to vector<1x32xf32>
    %cst_80 = arith.constant dense<0.000000e+00> : vector<16xf32>
    %180 = vector.multi_reduction <add>, %175, %cst_80 [1] : vector<16x32xf32> to vector<16xf32>
    %181 = vector.shape_cast %180 : vector<16xf32> to vector<16x1xf32>
    %cst_81 = arith.constant 3.200000e+01 : f32
    %182 = vector.broadcast %cst_81 : f32 to vector<16x1xf32>
    %183 = arith.divf %181, %182 : vector<16x1xf32>
    %184 = vector.broadcast %183 : vector<16x1xf32> to vector<16x32xf32>
    %185 = arith.subf %175, %184 : vector<16x32xf32>
    %186 = arith.mulf %185, %185 : vector<16x32xf32>
    %cst_82 = arith.constant dense<0.000000e+00> : vector<16xf32>
    %187 = vector.multi_reduction <add>, %186, %cst_82 [1] : vector<16x32xf32> to vector<16xf32>
    %188 = vector.shape_cast %187 : vector<16xf32> to vector<16x1xf32>
    %cst_83 = arith.constant 3.200000e+01 : f32
    %189 = vector.broadcast %cst_83 : f32 to vector<16x1xf32>
    %190 = arith.divf %188, %189 : vector<16x1xf32>
    %191 = vector.broadcast %183 : vector<16x1xf32> to vector<16x32xf32>
    %192 = arith.subf %175, %191 : vector<16x32xf32>
    %cst_84 = arith.constant 9.99999996E-13 : f32
    %193 = vector.broadcast %cst_84 : f32 to vector<16x1xf32>
    %194 = arith.addf %190, %193 : vector<16x1xf32>
    %195 = math.rsqrt %194 : vector<16x1xf32>
    %196 = vector.broadcast %195 : vector<16x1xf32> to vector<16x32xf32>
    %197 = arith.mulf %192, %196 : vector<16x32xf32>
    %198 = vector.broadcast %177 : vector<1x32xf32> to vector<16x32xf32>
    %199 = arith.mulf %197, %198 : vector<16x32xf32>
    %200 = vector.broadcast %179 : vector<1x32xf32> to vector<16x32xf32>
    %201 = arith.addf %199, %200 : vector<16x32xf32>
    %c0_85 = arith.constant 0 : index
    %c0_86 = arith.constant 0 : index
    %202 = vector.load %arg19[%c0_85, %c0_86] : memref<16x32xf32, #tpu.memory_space<vmem>>, vector<16x32xf32>
    tpu.vector_store %arg19[%c0_85, %c0_86], %201 {strides = array<i32>} : memref<16x32xf32, #tpu.memory_space<vmem>>, vector<16x32xf32>,
    %c1_i32 = arith.constant 1 : i32
    %203 = arith.cmpi eq, %arg1, %c1_i32 : i32
    %204 = arith.extui %203 : i1 to i32
    %c0_i32_87 = arith.constant 0 : i32
    %205 = arith.cmpi ne, %204, %c0_i32_87 : i32
    scf.if %205 {
      %206 = vector.extract_strided_slice %201 {offsets = [0, 0], sizes = [1, 32], strides = [1, 1]} : vector<16x32xf32> to vector<1x32xf32>
      %207 = vector.extract_strided_slice %201 {offsets = [8, 0], sizes = [1, 32], strides = [1, 1]} : vector<16x32xf32> to vector<1x32xf32>
      %208 = tpu.concatenate %206, %207 in 0 : vector<1x32xf32>, vector<1x32xf32> -> vector<2x32xf32>
      %c0_88 = arith.constant 0 : index
      %c0_89 = arith.constant 0 : index
      %c0_90 = arith.constant 0 : index
      %209 = vector.load %arg18[%c0_88, %c0_89, %c0_90] : memref<1x2x32xf32, #tpu.memory_space<vmem>>, vector<1x2x32xf32>
      %210 = vector.shape_cast %209 : vector<1x2x32xf32> to vector<2x32xf32>
      %211 = vector.shape_cast %208 : vector<2x32xf32> to vector<1x2x32xf32>
      tpu.vector_store %arg18[%c0_88, %c0_89, %c0_90], %211 {strides = array<i32>} : memref<1x2x32xf32, #tpu.memory_space<vmem>>, vector<1x2x32xf32>,
    } else {
    }
    return
  }
  func.func @transform_0(%arg0: i32, %arg1: i32) -> (i32, i32, i32) {
    %c0_i32 = arith.constant 0 : i32
    %c0_i32_0 = arith.constant 0 : i32
    %c0_i32_1 = arith.constant 0 : i32
    return %arg0, %c0_i32, %c0_i32_0 : i32, i32, i32
  }
  func.func @transform_1(%arg0: i32, %arg1: i32) -> (i32, i32, i32) {
    %c0_i32 = arith.constant 0 : i32
    %c0_i32_0 = arith.constant 0 : i32
    %c0_i32_1 = arith.constant 0 : i32
    return %arg0, %c0_i32, %c0_i32_0 : i32, i32, i32
  }
  func.func @transform_2(%arg0: i32, %arg1: i32) -> (i32, i32, i32) {
    %c0_i32 = arith.constant 0 : i32
    %c0_i32_0 = arith.constant 0 : i32
    %c0_i32_1 = arith.constant 0 : i32
    return %arg0, %c0_i32, %c0_i32_0 : i32, i32, i32
  }
  func.func @transform_3(%arg0: i32, %arg1: i32) -> (i32, i32, i32) {
    %c0_i32 = arith.constant 0 : i32
    %c0_i32_0 = arith.constant 0 : i32
    %c0_i32_1 = arith.constant 0 : i32
    return %arg0, %c0_i32, %c0_i32_0 : i32, i32, i32
  }
  func.func @transform_4(%arg0: i32, %arg1: i32) -> (i32, i32, i32, i32) {
    %c0_i32 = arith.constant 0 : i32
    %c0_i32_0 = arith.constant 0 : i32
    %c0_i32_1 = arith.constant 0 : i32
    return %arg0, %arg1, %c0_i32, %c0_i32_0 : i32, i32, i32, i32
  }
  func.func @transform_5(%arg0: i32, %arg1: i32) -> (i32, i32, i32, i32) {
    %c0_i32 = arith.constant 0 : i32
    %c0_i32_0 = arith.constant 0 : i32
    %c0_i32_1 = arith.constant 0 : i32
    return %arg0, %arg1, %c0_i32, %c0_i32_0 : i32, i32, i32, i32
  }
  func.func @transform_6(%arg0: i32, %arg1: i32) -> (i32, i32, i32, i32) {
    %c0_i32 = arith.constant 0 : i32
    %c0_i32_0 = arith.constant 0 : i32
    %c0_i32_1 = arith.constant 0 : i32
    return %arg0, %arg1, %c0_i32, %c0_i32_0 : i32, i32, i32, i32
  }
  func.func @transform_7(%arg0: i32, %arg1: i32) -> (i32, i32, i32, i32) {
    %c0_i32 = arith.constant 0 : i32
    %c0_i32_0 = arith.constant 0 : i32
    %c0_i32_1 = arith.constant 0 : i32
    return %arg0, %arg1, %c0_i32, %c0_i32_0 : i32, i32, i32, i32
  }
  func.func @transform_8(%arg0: i32, %arg1: i32) -> (i32, i32, i32, i32) {
    %c0_i32 = arith.constant 0 : i32
    %c0_i32_0 = arith.constant 0 : i32
    %c0_i32_1 = arith.constant 0 : i32
    return %arg0, %arg1, %c0_i32, %c0_i32_0 : i32, i32, i32, i32
  }
  func.func @transform_9(%arg0: i32, %arg1: i32) -> (i32, i32, i32, i32) {
    %c0_i32 = arith.constant 0 : i32
    %c0_i32_0 = arith.constant 0 : i32
    %c0_i32_1 = arith.constant 0 : i32
    return %arg0, %arg1, %c0_i32, %c0_i32_0 : i32, i32, i32, i32
  }
  func.func @transform_10(%arg0: i32, %arg1: i32) -> (i32, i32, i32, i32) {
    %c0_i32 = arith.constant 0 : i32
    %c0_i32_0 = arith.constant 0 : i32
    %c0_i32_1 = arith.constant 0 : i32
    return %arg0, %arg1, %c0_i32, %c0_i32_0 : i32, i32, i32, i32
  }
  func.func @transform_11(%arg0: i32, %arg1: i32) -> (i32, i32, i32, i32) {
    %c0_i32 = arith.constant 0 : i32
    %c0_i32_0 = arith.constant 0 : i32
    %c0_i32_1 = arith.constant 0 : i32
    return %arg0, %arg1, %c0_i32, %c0_i32_0 : i32, i32, i32, i32
  }
  func.func @transform_12(%arg0: i32, %arg1: i32) -> (i32, i32, i32, i32) {
    %c0_i32 = arith.constant 0 : i32
    %c0_i32_0 = arith.constant 0 : i32
    %c0_i32_1 = arith.constant 0 : i32
    return %arg0, %arg1, %c0_i32, %c0_i32_0 : i32, i32, i32, i32
  }
  func.func @transform_13(%arg0: i32, %arg1: i32) -> (i32, i32, i32, i32) {
    %c0_i32 = arith.constant 0 : i32
    %c0_i32_0 = arith.constant 0 : i32
    %c0_i32_1 = arith.constant 0 : i32
    return %arg0, %arg1, %c0_i32, %c0_i32_0 : i32, i32, i32, i32
  }
  func.func @transform_14(%arg0: i32, %arg1: i32) -> (i32, i32, i32, i32) {
    %c0_i32 = arith.constant 0 : i32
    %c0_i32_0 = arith.constant 0 : i32
    %c0_i32_1 = arith.constant 0 : i32
    return %arg0, %arg1, %c0_i32, %c0_i32_0 : i32, i32, i32, i32
  }
  func.func @transform_15(%arg0: i32, %arg1: i32) -> (i32, i32, i32, i32) {
    %c0_i32 = arith.constant 0 : i32
    %c0_i32_0 = arith.constant 0 : i32
    %c0_i32_1 = arith.constant 0 : i32
    return %arg0, %arg1, %c0_i32, %c0_i32_0 : i32, i32, i32, i32
  }
  func.func @transform_16(%arg0: i32, %arg1: i32) -> (i32, i32, i32) {
    %c0_i32 = arith.constant 0 : i32
    %c0_i32_0 = arith.constant 0 : i32
    %c0_i32_1 = arith.constant 0 : i32
    return %arg0, %c0_i32, %c0_i32_0 : i32, i32, i32
  }
}

</mosaic_0001>

<bundles_post_ra>
// kernel: biencoder_forward.1
= control target key start
LH: loop header
LB: loop body
LE: loop exit
PB: predicated region body
PF: predicated region fallthrough
CT: control target
= control target key end

     0   :  { %s3171_s21 = smov 0   ;;  %s3173_s22 = smov 0   ;;  %s3571_s0 = inlined_call_operand.vmem [shape: f32[2,16,32], index: 0, kind: input, shape index: {}]   ;;  %s3572_s1 = inlined_call_operand.vmem [shape: f32[2,2,8], index: 1, kind: input, shape index: {}]   ;;  %s3573_s2 = inlined_call_operand.vmem [shape: f32[2,1,32], index: 2, kind: input, shape index: {}]   ;;  %s3574_s3 = inlined_call_operand.vmem [shape: f32[2,1,32], index: 3, kind: input, shape index: {}]   ;;  %s3575_s4 = inlined_call_operand.vmem [shape: bf16[2,2,32,96], index: 4, kind: input, shape index: {}]   ;;  %s3576_s5 = inlined_call_operand.vmem [shape: f32[2,2,1,96], index: 5, kind: input, shape index: {}]   ;;  %s3577_s6 = inlined_call_operand.vmem [shape: bf16[2,2,32,32], index: 6, kind: input, shape index: {}]   ;;  %s3578_s7 = inlined_call_operand.vmem [shape: f32[2,2,1,32], index: 7, kind: input, shape index: {}]   ;;  %s3579_s8 = inlined_call_operand.vmem [shape: f32[2,2,1,32], index: 8, kind: input, shape index: {}]   ;;  %s3580_s9 = inlined_call_operand.vmem [shape: f32[2,2,1,32], index: 9, kind: input, shape index: {}]   ;;  %s3581_s10 = inlined_call_operand.vmem [shape: bf16[2,2,32,64], index: 10, kind: input, shape index: {}]   ;;  %s3582_s11 = inlined_call_operand.vmem [shape: f32[2,2,1,64], index: 11, kind: input, shape index: {}]   ;;  %s3583_s12 = inlined_call_operand.vmem [shape: bf16[2,2,64,32], index: 12, kind: input, shape index: {}]   ;;  %s3584_s13 = inlined_call_operand.vmem [shape: f32[2,2,1,32], index: 13, kind: input, shape index: {}]   ;;  %s3585_s14 = inlined_call_operand.vmem [shape: f32[2,2,1,32], index: 14, kind: input, shape index: {}]   ;;  %s3586_s15 = inlined_call_operand.vmem [shape: f32[2,2,1,32], index: 15, kind: input, shape index: {}]   ;;  %s3587_s16 = inlined_call_operand.vmem [shape: f32[2,2,32], index: 16, kind: output, shape index: {}]  }
   0x1   :  { %3593 = sst [smem:[#allocation10_spill]] %s3571_s0  ;;  %s3175_s23 = smov 0  }
   0x2   :  { %3594 = sst [smem:[#allocation11_spill]] %s3572_s1  ;;  %s3177_s24 = smov 0  }
   0x3   :  { %3595 = sst [smem:[#allocation12_spill]] %s3575_s4  ;;  %s3179_s25 = smov 0  }
   0x4   :  { %3596 = sst [smem:[#allocation13_spill]] %s3576_s5 }
   0x5   :  { %3597 = sst [smem:[#allocation14_spill]] %s3577_s6 }
   0x6   :  { %3598 = sst [smem:[#allocation15_spill]] %s3578_s7 }
   0x7   :  { %3599 = sst [smem:[#allocation16_spill]] %s3579_s8 }
   0x8   :  { %3600 = sst [smem:[#allocation17_spill]] %s3580_s9 }
   0x9   :  { %3601 = sst [smem:[#allocation18_spill]] %s3581_s10 }
   0xa   :  { %3602 = sst [smem:[#allocation19_spill]] %s3582_s11 }
   0xb   :  { %3603 = sst [smem:[#allocation20_spill]] %s3583_s12 }
   0xc   :  { %3604 = sst [smem:[#allocation21_spill]] %s3584_s13 }
   0xd   :  { %3605 = sst [smem:[#allocation22_spill]] %s3585_s14 }
   0xe   :  { %3606 = sst [smem:[#allocation23_spill]] %s3586_s15 }
   0xf   :  { %3607 = sst [smem:[#allocation24_spill]] %s3587_s16 }
  0x10 LB: > { %3608 = sst [smem:[#allocation3_spill]] %s3051_s21  ;;  %s35_s26 = sadd.s32 1, %s3059_s23  ;;  %s3067_s25 = sphi %s3179_s25, %s26_s25   ;;  %s3063_s24 = sphi %s3177_s24, %s3654_s24   ;;  %s3059_s23 = sphi %s3175_s23, %s3653_s23   ;;  %s3055_s22 = sphi %s3173_s22, %s3652_s22   ;;  %s3051_s21 = sphi %s3171_s21, %s3651_s21  }
  0x11   : > { %3609 = sst [smem:[#allocation4_spill]] %s3059_s23  ;;  %s38_s27 = sadd.s32 1, %s3063_s24 }
  0x12   : > { %3610 = sst [smem:[#allocation5_spill]] %s3063_s24  ;;  %p36_p0 = scmp.ge.s32.totalorder %s35_s26, 2 }
  0x13   : > { %3611 = sst [smem:[#allocation6_spill]] %s3067_s25  ;;  %p2650_p1 = scmp.ge.s32.totalorder %s3067_s25, 1 }
  0x14   : > { %p675_p2 = scmp.lt.s32.totalorder %s3067_s25, 5  ;;  %s3656_s26 = smov (%p36_p0, %s35_s26), 0 }
  0x15   : > { %3612 = sst [smem:[#allocation7_spill]] %s3656_s26  ;;  %s3658_s27 = smov (!%p36_p0, %s38_s27), %s3063_s24 }
  0x16   : > { %p676_p3 = pnand %p2650_p1, %p675_p2  ;;  %p40_p4 = scmp.ge.s32.totalorder %s3658_s27, 2 }
  0x18   : > { %s3660_s27 = smov (%p40_p4, %s3658_s27), 0  ;;  %679 = sbr.rel (%p676_p3) target bundleno = 4504 (0x1198), region = 84 }
  0x19   : > { %3613 = sst [smem:[#allocation8_spill]] %s3660_s27 }
  0x1f   : > { %p826_p5 = scmp.lt.s32.totalorder %s3055_s22, 1  ;;  %p843_p6 = scmp.lt.s32.totalorder %s3051_s21, 1 }
  0x20   : > { %s3614_s18 = sld [smem:[#allocation10_spill]]  ;;  %s3617_s4 = sld [smem:[#allocation12_spill]] }
  0x21   : > { %s3662_s22 = smov (!%p826_p5, %s3055_s22), 1  ;;  %s3618_s6 = sld [smem:[#allocation14_spill]] }
  0x22   : > { %s844_s28 = scalar_select %p843_p6, %s3051_s21, 1 }
  0x23   : > { %s2720_s29 = sshll.u32 %s3662_s22, 4  ;;  %s3209_s30 = sshll.u32 %s3662_s22, 1 }
  0x24   : > { %s2654_s12 = sshll.u32 %s844_s28, 2  ;;  %s2655_s14 = sshll.u32 %s3662_s22, 3 }
  0x25   : > { %s847_s13 = sadd.s32 %s2655_s14, %s2654_s12  ;;  %s3228_s11 = sadd.s32 %s3209_s30, %s844_s28 }
  0x26   : > { %s830_s19 = scalar_lea.vmem %s3614_s18, %s2720_s29  ;;  %s2656_s27 = sshll.u32 %s847_s13, 2 }
  0x27   : > { %s3237_s12 = scalar_lea.vmem %s3617_s4, %s2656_s27  ;;  %s3242_s18 = scalar_lea.vmem %s3618_s6, %s2656_s27 }
  0x28   : > { %3619 = sst [smem:[#allocation9_spill]] %s3242_s18  ;;  %s3624_s6 = sld [smem:[#allocation19_spill]] }
  0x29   : > { %s3623_s10 = sld [smem:[#allocation18_spill]]  ;;  %s2668_s5 = sshll.u32 %s844_s28, 3 }
  0x2a   : > { %s909_s26 = sadd.s32 %s2720_s29, %s2668_s5  ;;  %s3625_s7 = sld [smem:[#allocation21_spill]] }
  0x2b   : > { %s2670_s13 = sshll.u32 %s909_s26, 2  ;;  %s3626_s15 = sld [smem:[#allocation22_spill]] }
  0x2c   : > { %s3627_s16 = sld [smem:[#allocation20_spill]]  ;;  %s3628_s14 = sld [smem:[#allocation23_spill]] }
  0x2d   : > { %s3629_s29 = sld [smem:[#allocation24_spill]]  ;;  %s3630_s21 = sld [smem:[#allocation3_spill]] }
  0x2e   : > { %s902_s18 = scalar_lea.vmem %s3624_s6, %s3228_s11 }
  0x2f   : > { %s3259_s4 = scalar_lea.vmem %s3623_s10, %s2656_s27 }
  0x30   : > { %s918_s25 = scalar_lea.vmem %s3625_s7, %s3228_s11 }
  0x31   : > { %s925_s24 = scalar_lea.vmem %s3626_s15, %s3228_s11 }
  0x32   : > { %s3276_s27 = scalar_lea.vmem %s3627_s16, %s2670_s13  ;;  %s932_s6 = scalar_lea.vmem %s3628_s14, %s3228_s11 }
  0x33   : > { %s936_s17 = scalar_lea.vmem %s3629_s29, %s3209_s30  ;;  %p2675_p7 = scmp.ne.s32.totalorder %s3630_s21, 0 }
  0x34   : > { %v942_v0 = vld [vmem:[%s830_s19] sm:$0xff] (!%p2675_p7)  ;;  %vm946_vm0 = vcmask (!%p2675_p7), 261120   ;;  %v943_v1 = vld [vmem:[%s830_s19 + $0x8] sm:$0xff] (!%p2675_p7)  ;;  %s3631_s8 = scalar_lea.vmem (!%p2675_p7), %s3573_s2, %s3662_s22  ;;  %s3632_s19 = scalar_lea.vmem (!%p2675_p7), %s3574_s3, %s3662_s22 }
  0x35   : > { %941 = sbr.rel (%p2675_p7) target bundleno = 371 (0x173), region = 88  ;;  %v947_v2 = vsel (!%p2675_p7), %vm946_vm0, %v942_v0, 0.0  ;;  %v950_v3 = vsel (!%p2675_p7), %vm946_vm0, %v943_v1, 0.0  ;;  %v2676_v21 = vld [vmem:[%s3631_s8] ss:$0 sm:$0xff] (!%p2675_p7) }
  0x36   : > { %948 = vadd.xlane.f32.xlu0 (!%p2675_p7), %v947_v2  ;;  %v2677_v23 = vld [vmem:[%s3632_s19] ss:$0 sm:$0xff] (!%p2675_p7) }
  0x3a   : > { %951 = vadd.xlane.f32.xlu0 (!%p2675_p7), %v950_v3 }
  0xc3   : > { %v949_v4 = vpop.xlane.xlu0 %948 }
  0xc4   : > { %v954_v5 = vmul.f32 0.03125, %v949_v4 }
  0xc6   : > { %v956_v6 = vsub.f32 %v942_v0, %v954_v5 }
  0xc7   : > { %v952_v7 = vpop.xlane.xlu0 %951 }
  0xc8   : > { %v955_v8 = vmul.f32 0.03125, %v952_v7  ;;  %v958_v9 = vmul.f32 %v956_v6, %v956_v6 }
  0xca   : > { %v957_v10 = vsub.f32 %v943_v1, %v955_v8  ;;  %v960_v11 = vsel %vm946_vm0, %v958_v9, 0.0 }
  0xcb   : > { %961 = vadd.xlane.f32.xlu1 %v960_v11 }
  0xcc   : > { %v959_v12 = vmul.f32 %v957_v10, %v957_v10 }
  0xce   : > { %v963_v13 = vsel %vm946_vm0, %v959_v12, 0.0 }
  0xcf   : > { %964 = vadd.xlane.f32.xlu1 %v963_v13 }
 0x158   : > { %v962_v14 = vpop.xlane.xlu1 %961 }
 0x159   : > { %v966_v15 = vmul.f32 0.03125, %v962_v14 }
 0x15b   : > { %v968_v16 = vadd.f32 1e-12, %v966_v15 }
 0x15c   : > { %v965_v17 = vpop.xlane.xlu1 %964 }
 0x15d   : > { %2956 = vrsqrt.f32 %v968_v16  ;;  %v967_v18 = vmul.f32 0.03125, %v965_v17 }
 0x15f   : > { %v969_v19 = vadd.f32 1e-12, %v967_v18 }
 0x161   : > { %2958 = vrsqrt.f32 %v969_v19 }
 0x167   : > { %v2957_v20 = vpop.eup %2956 }
 0x168   : > { %v972_v22 = vmul.f32 %v2957_v20, %v956_v6 }
 0x16a   : > { %v980_v24 = vmul.f32 %v2676_v21, %v972_v22 }
 0x16b   : > { %v2959_v25 = vpop.eup %2958 }
 0x16c   : > { %v988_v26 = vadd.f32 %v2677_v23, %v980_v24  ;;  %v973_v27 = vmul.f32 %v2959_v25, %v957_v10 }
 0x16e   : > { %990 = vst.msk [vmem:[#allocation2] sm:$0xff] %vm946_vm0, %v988_v26  ;;  %v981_v28 = vmul.f32 %v2676_v21, %v973_v27 }
 0x170   : > { %v989_v29 = vadd.f32 %v2677_v23, %v981_v28 }
 0x172   : > { %991 = vst.msk [vmem:[#allocation2 + $0x8] sm:$0xff] %vm946_vm0, %v989_v29 }
 0x173 PF: > { %v2975_v30 = vld [vmem:[%s3237_s12] sm:$0xff]   ;;  %v3069_v31 = vmov 0.0   ;;  %v2976_v32 = vld [vmem:[%s3237_s12 + $0x8] sm:$0xff]   ;;  %vm3070_vm1 = vmmov 0   ;;  %vm1018_vm2 = vcmask 261120   ;;  %s3633_s23 = sld [smem:[#allocation13_spill]]  ;;  %v1076_v51 = vlaneseq }
 0x174   : > { %2767 = vmatprep.subr.bf16.mxu0 %v3069_v31  ;;  %2775 = vmatprep.subr.bf16.mxu1 %v3069_v31  ;;  %s3071_s20 = smov 96   ;;  %vm1102_vm3 = vcmask 64512   ;;  %v3072_v49 = vmov 1966171168   ;;  %s3635_s16 = sld [smem:[#allocation11_spill]]  ;;  %vm1227_vm4 = vcmask 1043456  }
 0x175   : > { %2768 = vmatpush3.bf16.msra.mxu0 %v2975_v30  ;;  %2771 = vmatprep.mubr.msk.bf16.mxu0 %vm3070_vm1, %v3069_v31  ;;  %v3309_v33 = vld [vmem:[#allocation2] sm:$0xff]  ;;  %v1074_v50 = vunpack.c.l.s4 %v3072_v49  ;;  %v1077_v53 = vshrl.u32 %v1076_v51, 7  ;;  %s3073_s14 = smov 64   ;;  %s3074_s28 = smov 88   ;;  %vm2005_vm5 = vcmask 130048   ;;  %vm2008_vm6 = vcmask 195584  }
 0x176   : > { %2769 = vmatprep.subr.bf16.mxu0 %v3069_v31  ;;  %2777 = vmatprep.mubr.msk.bf16.mxu1 %vm3070_vm1, %v3069_v31  ;;  %s3075_s5 = smov 120   ;;  %s3076_s29 = smov 56   ;;  %vm2244_vm7 = vcmask 523264  }
 0x177   : > { %v1075_v52 = vunpack.c.0.s8 %v1074_v50  ;;  %v1091_v57 = vsub.s32 0, %v1077_v53  ;;  %s3077_s21 = smov 80   ;;  %s3078_s1 = smov 112  }
 0x178   : > { %s3079_s7 = smov 48   ;;  %s3080_s8 = smov 72  }
 0x179   : > { %v3311_v34 = vld [vmem:[#allocation2 + $0x8] sm:$0xff]  ;;  %2770 = vmatpush3.bf16.msra.mxu0 %v2976_v32  ;;  %s3634_s26 = scalar_lea.vmem %s3633_s23, %s3228_s11  ;;  %v1078_v54 = vsub.s32 %v1075_v52, %v1077_v53  ;;  %s3081_s9 = smov 104  }
 0x17a   : > { %v994_v35 = vpack.c.bf16 %v3311_v34, %v3309_v33  ;;  %2781 = vmatprep.subr.bf16.mxu0 %v3069_v31  ;;  %v2678_v36 = vld [vmem:[%s3634_s26] ss:$0 sm:$0xff]  ;;  %s3636_s0 = scalar_lea.vmem %s3635_s16, %s3209_s30  ;;  %s3082_s10 = smov 40  }
 0x17b   : > { %v2682_v55 = vld.sshfl [vmem:[%s3636_s0] sm:$0x11 pattern:$0x75316420]  ;;  %s3083_s19 = smov 8   ;;  %s3084_s22 = smov 16  }
 0x17c   : > { %2772 = vmatmul.mubr.msk.bf16.vlgmr.msra.gmra.mrb[0].mxu0 %vm1018_vm2, %v994_v35  ;;  %v1079_v56 = vrot.slane %v2682_v55, %v1078_v54  ;;  %v1072_v58 = vcombine.high %v2682_v55, %v2682_v55  ;;  %s3637_s12 = sld [smem:[#allocation9_spill]]  ;;  %s3085_s23 = smov 24  }
 0x17d   : > { %2783 = vmatprep.mubr.msk.bf16.mxu0 %vm3070_vm1, %v3069_v31  ;;  %s3638_s13 = sld [smem:[#allocation15_spill]]  ;;  %s3648_s26 = sld [smem:[#allocation3_spill]] }
 0x17e   : > { %v3350_v59 = vrot.slane %v1079_v56, %v1091_v57  ;;  %v1086_v60 = vrot.slane %v1072_v58, %v1078_v54 }
 0x180   : > { %v3353_v0 = vrot.slane %v1086_v60, %v1091_v57 }
 0x183   : > { %s3639_s15 = scalar_lea.vmem %s3638_s13, %s3228_s11  ;;  %p2717_p8 = scmp.ne.s32.totalorder %s3648_s26, 1 }
 0x184   : > { %vm2344_vm8 = vcmask (!%p2717_p8), 1040384   ;;  %vm2346_vm9 = vcmask (!%p2717_p8), 254976  }
 0x24f   : > { %v1056_v37 = vpop.f32.mrb[0].mxu0 }
 0x250   : > { %v1057_v38 = vadd.f32 %v2678_v36, %v1056_v37  ;;  %v2773_v39 = vpop.f32.mrb[1].mxu0 }
 0x251   : > { %v1059_v40 = vpop.f32.mrb[2].mxu0 }
 0x252   : > { %v3327_v41 = vpack.c.bf16 %v1057_v38, %v1057_v38  ;;  %v1060_v42 = vadd.f32 %v2678_v36, %v1059_v40  ;;  %v2774_v43 = vpop.f32.mrb[3].mxu0 }
 0x254   : > { %1100 = vrot.lane.b32.xlu0 %v3327_v41, %s3071_s20  ;;  %v3330_v44 = vpack.c.bf16 %v1060_v42, %v1060_v42 }
 0x258   : > { %1150 = vrot.lane.b32.xlu0 %v3330_v44, %s3071_s20 }
 0x2c6   : > { %v1101_v45 = vpop.permute.xlu0 %1100 }
 0x2c7   : > { %v1107_v46 = vsel %vm1102_vm3, %v1101_v45, 0 }
 0x2c8   : > { %2776 = vmatpush3.bf16.xpose.msra.mxu1 %v1107_v46 }
 0x2c9   : > { %2787 = vmatprep.subr.bf16.mxu1 %v3069_v31 }
 0x2ca   : > { %v1151_v47 = vpop.permute.xlu0 %1150 }
 0x2cb   : > { %v1156_v48 = vsel %vm1102_vm3, %v1151_v47, 0 }
 0x2cc   : > { %2782 = vmatpush3.bf16.xpose.msra.mxu0 %v1156_v48 }
 0x2cd   : > { %2793 = vmatprep.subr.bf16.mxu0 %v3069_v31 }
 0x2cf   : > { %2778 = vmatmul.mubr.msk.bf16.vlgmr.msra.gmra.mrb[0].mxu1 %vm1102_vm3, %v3327_v41 }
 0x2d0   : > { %2789 = vmatprep.mubr.msk.bf16.mxu1 %vm3070_vm1, %v3069_v31 }
 0x2d3   : > { %2784 = vmatmul.mubr.msk.bf16.vlgmr.msra.gmra.mrb[4].mxu0 %vm1102_vm3, %v3330_v44 }
 0x2d4   : > { %2795 = vmatprep.mubr.msk.bf16.mxu0 %vm3070_vm1, %v3069_v31 }
 0x3a2   : > { %v1143_v61 = vpop.f32.mrb[0].mxu1 }
 0x3a3   : > { %v1144_v62 = vadd.f32 %v1143_v61, %v3350_v59  ;;  %v2779_v63 = vpop.f32.mrb[1].mxu1 }
 0x3a4   : > { %v1146_v1 = vpop.f32.mrb[2].mxu1 }
 0x3a5   : > { %v2780_v2 = vpop.f32.mrb[3].mxu1  ;;  %v1198_v3 = vsel %vm1102_vm3, %v1144_v62, -inf }
 0x3a6   : > { %1199 = vmax.xlane.f32.xlu1 %v1198_v3  ;;  %v1192_v4 = vpop.f32.mrb[4].mxu0 }
 0x3a7   : > { %v1193_v5 = vadd.f32 %v1192_v4, %v3353_v0  ;;  %v2785_v6 = vpop.f32.mrb[5].mxu0 }
 0x3a8   : > { %v1195_v7 = vpop.f32.mrb[6].mxu0 }
 0x3a9   : > { %v2786_v8 = vpop.f32.mrb[7].mxu0  ;;  %v1201_v9 = vsel %vm1102_vm3, %v1193_v5, -inf }
 0x3aa   : > { %1202 = vmax.xlane.f32.xlu1 %v1201_v9 }
 0x3bb   : > { %1222 = vrot.lane.b32.xlu1 %v3327_v41, %s3073_s14 }
 0x3bf   : > { %1271 = vrot.lane.b32.xlu1 %v3330_v44, %s3073_s14  ;;  %s3640_s14 = sld [smem:[#allocation16_spill]] }
 0x3c3   : > { %1321 = vrot.lane.b32.xlu1 %v3327_v41, %s3074_s28 }
 0x433   : > { %v1200_v10 = vpop.xlane.xlu1 %1199 }
 0x434   : > { %v1204_v11 = vsub.f32 %v1144_v62, %v1200_v10 }
 0x436   : > { %v1206_v12 = vmul.f32 1.442695, %v1204_v11 }
 0x437   : > { %v1203_v13 = vpop.xlane.xlu1 %1202 }
 0x438   : > { %2985 = vpow2.f32 %v1206_v12  ;;  %v1205_v14 = vsub.f32 %v1193_v5, %v1203_v13 }
 0x43a   : > { %v1208_v15 = vmul.f32 1.442695, %v1205_v14 }
 0x43b   : > { %v1223_v16 = vpop.permute.xlu1 %1222 }
 0x43c   : > { %2987 = vpow2.f32 %v1208_v15  ;;  %v1229_v17 = vsel %vm1227_vm4, %v1223_v16, 0 }
 0x43d   : > { %2788 = vmatpush3.bf16.msra.mxu1 %v1229_v17 }
 0x43e   : > { %2799 = vmatprep.subr.bf16.mxu1 %v3069_v31 }
 0x43f   : > { %v1272_v18 = vpop.permute.xlu1 %1271 }
 0x440   : > { %v1277_v19 = vsel %vm1227_vm4, %v1272_v18, 0 }
 0x441   : > { %2794 = vmatpush3.bf16.msra.mxu0 %v1277_v19 }
 0x442   : > { %v2986_v20 = vpop.eup %2985  ;;  %2805 = vmatprep.subr.bf16.mxu0 %v3069_v31 }
 0x443   : > { %v1210_v21 = vsel %vm1102_vm3, %v2986_v20, 0.0  ;;  %v1322_v24 = vpop.permute.xlu1 %1321 }
 0x444   : > { %1211 = vadd.xlane.f32.xlu0 %v1210_v21  ;;  %v1327_v32 = vsel %vm1102_vm3, %v1322_v24, 0 }
 0x446   : > { %v2988_v22 = vpop.eup %2987 }
 0x447   : > { %v1213_v23 = vsel %vm1102_vm3, %v2988_v22, 0.0 }
 0x448   : > { %1214 = vadd.xlane.f32.xlu1 %v1213_v23 }
 0x459   : > { %1371 = vrot.lane.b32.xlu1 %v3330_v44, %s3074_s28  ;;  %s3641_s28 = scalar_lea.vmem %s3640_s14, %s3228_s11 }
 0x45a   : > { %1319 = vrot.lane.b32.xlu0 %v3327_v41, %s3075_s5 }
 0x45d   : > { %1369 = vrot.lane.b32.xlu1 %v3330_v44, %s3075_s5 }
 0x4d1   : > { %v1212_v25 = vpop.xlane.xlu0 %1211 }
 0x4d2   : > { %2989 = vrcp.f32 %v1212_v25 }
 0x4d5   : > { %v1215_v26 = vpop.xlane.xlu1 %1214  ;;  %v1320_v39 = vpop.permute.xlu0 %1319 }
 0x4d6   : > { %2991 = vrcp.f32 %v1215_v26 }
 0x4d9   : > { %v1372_v36 = vpop.permute.xlu1 %1371 }
 0x4da   : > { %v1377_v38 = vsel %vm1102_vm3, %v1372_v36, 0 }
 0x4dc   : > { %v2990_v27 = vpop.eup %2989 }
 0x4dd   : > { %v1218_v28 = vmul.f32 %v2990_v27, %v2986_v20  ;;  %v1370_v40 = vpop.permute.xlu1 %1369 }
 0x4df   : > { %v1220_v29 = vpack.c.bf16 %v1218_v28, %v1218_v28 }
 0x4e0   : > { %v2992_v30 = vpop.eup %2991 }
 0x4e1   : > { %v1219_v35 = vmul.f32 %v2992_v30, %v2988_v22  ;;  %2790 = vmatmul.mubr.msk.bf16.vlgmr.msra.gmra.mrb[4].mxu1 %vm1102_vm3, %v1220_v29 }
 0x4e2   : > { %2800 = vmatpush3.bf16.xpose.msra.mxu1 %v1327_v32  ;;  %2801 = vmatprep.mubr.msk.bf16.mxu1 %vm3070_vm1, %v3069_v31 }
 0x4e3   : > { %v1221_v37 = vpack.c.bf16 %v1219_v35, %v1219_v35  ;;  %2811 = vmatprep.subr.bf16.mxu1 %v3069_v31 }
 0x4e5   : > { %2796 = vmatmul.mubr.msk.bf16.vlgmr.msra.gmra.mrb[8].mxu0 %vm1102_vm3, %v1221_v37 }
 0x4e6   : > { %2806 = vmatpush3.bf16.xpose.msra.mxu0 %v1377_v38  ;;  %2807 = vmatprep.mubr.msk.bf16.mxu0 %vm3070_vm1, %v3069_v31 }
 0x4e7   : > { %2817 = vmatprep.subr.bf16.mxu0 %v3069_v31 }
 0x4e9   : > { %2802 = vmatmul.mubr.msk.bf16.vlgmr.msra.gmra.mrb[8].mxu1 %vm1102_vm3, %v1320_v39 }
 0x4ea   : > { %2813 = vmatprep.mubr.msk.bf16.mxu1 %vm3070_vm1, %v3069_v31 }
 0x4ed   : > { %2808 = vmatmul.mubr.msk.bf16.vlgmr.msra.gmra.mrb[12].mxu0 %vm1102_vm3, %v1370_v40 }
 0x4ee   : > { %2819 = vmatprep.mubr.msk.bf16.mxu0 %vm3070_vm1, %v3069_v31 }
 0x5b4   : > { %v3386_v42 = vpop.f32.mrb[4].mxu1 }
 0x5b5   : > { %v2791_v43 = vpop.f32.mrb[5].mxu1 }
 0x5b6   : > { %v1268_v45 = vpop.f32.mrb[6].mxu1 }
 0x5b7   : > { %v2792_v46 = vpop.f32.mrb[7].mxu1 }
 0x5b8   : > { %v3388_v47 = vpop.f32.mrb[8].mxu0 }
 0x5b9   : > { %v2797_v48 = vpop.f32.mrb[9].mxu0 }
 0x5ba   : > { %v1316_v49 = vpop.f32.mrb[10].mxu0 }
 0x5bb   : > { %v2798_v50 = vpop.f32.mrb[11].mxu0 }
 0x5bc   : > { %v1363_v51 = vpop.f32.mrb[8].mxu1 }
 0x5bd   : > { %v1364_v52 = vadd.f32 %v1363_v51, %v3350_v59  ;;  %v2803_v53 = vpop.f32.mrb[9].mxu1 }
 0x5be   : > { %v1366_v54 = vpop.f32.mrb[10].mxu1 }
 0x5bf   : > { %v2804_v55 = vpop.f32.mrb[11].mxu1  ;;  %v1419_v56 = vsel %vm1102_vm3, %v1364_v52, -inf }
 0x5c0   : > { %1420 = vmax.xlane.f32.xlu1 %v1419_v56  ;;  %v1413_v57 = vpop.f32.mrb[12].mxu0 }
 0x5c1   : > { %v1414_v58 = vadd.f32 %v1413_v57, %v3353_v0  ;;  %v2809_v60 = vpop.f32.mrb[13].mxu0 }
 0x5c2   : > { %v1416_v61 = vpop.f32.mrb[14].mxu0 }
 0x5c3   : > { %v2810_v62 = vpop.f32.mrb[15].mxu0  ;;  %v1422_v63 = vsel %vm1102_vm3, %v1414_v58, -inf }
 0x5c4   : > { %1423 = vmax.xlane.f32.xlu0 %v1422_v63 }
 0x5d1   : > { %1443 = vrot.lane.b32.xlu1 %v3327_v41, %s3076_s29 }
 0x5d5   : > { %1541 = vrot.lane.b32.xlu1 %v3327_v41, %s3077_s21 }
 0x5da   : > { %1491 = vrot.lane.b32.xlu0 %v3330_v44, %s3076_s29  ;;  %s3642_s29 = sld [smem:[#allocation17_spill]] }
 0x5de   : > { %1539 = vrot.lane.b32.xlu0 %v3327_v41, %s3078_s1 }
 0x64d   : > { %v1421_v1 = vpop.xlane.xlu1 %1420 }
 0x64e   : > { %v1425_v2 = vsub.f32 %v1364_v52, %v1421_v1 }
 0x650   : > { %v1427_v3 = vmul.f32 1.442695, %v1425_v2 }
 0x651   : > { %v1444_v4 = vpop.permute.xlu1 %1443  ;;  %v1424_v5 = vpop.xlane.xlu0 %1423 }
 0x652   : > { %2993 = vpow2.f32 %v1427_v3  ;;  %v1449_v6 = vsel %vm1227_vm4, %v1444_v4, 0  ;;  %v1426_v7 = vsub.f32 %v1414_v58, %v1424_v5 }
 0x653   : > { %2812 = vmatpush3.bf16.msra.mxu1 %v1449_v6 }
 0x654   : > { %v1429_v8 = vmul.f32 1.442695, %v1426_v7  ;;  %2823 = vmatprep.subr.bf16.mxu1 %v3069_v31 }
 0x655   : > { %v1492_v9 = vpop.permute.xlu0 %1491  ;;  %v1542_v15 = vpop.permute.xlu1 %1541 }
 0x656   : > { %2995 = vpow2.f32 %v1429_v8  ;;  %v1497_v10 = vsel %vm1227_vm4, %v1492_v9, 0  ;;  %v1547_v22 = vsel %vm1102_vm3, %v1542_v15, 0 }
 0x657   : > { %2818 = vmatpush3.bf16.msra.mxu0 %v1497_v10 }
 0x658   : > { %2829 = vmatprep.subr.bf16.mxu0 %v3069_v31 }
 0x659   : > { %v1540_v27 = vpop.permute.xlu0 %1539 }
 0x65c   : > { %v2994_v11 = vpop.eup %2993 }
 0x65d   : > { %v1431_v12 = vsel %vm1102_vm3, %v2994_v11, 0.0 }
 0x65e   : > { %1432 = vadd.xlane.f32.xlu1 %v1431_v12 }
 0x660   : > { %v2996_v13 = vpop.eup %2995 }
 0x661   : > { %v1434_v14 = vsel %vm1102_vm3, %v2996_v13, 0.0 }
 0x662   : > { %1435 = vadd.xlane.f32.xlu1 %v1434_v14 }
 0x673   : > { %1591 = vrot.lane.b32.xlu1 %v3330_v44, %s3077_s21  ;;  %s3643_s21 = scalar_lea.vmem %s3642_s29, %s3228_s11 }
 0x677   : > { %1589 = vrot.lane.b32.xlu1 %v3330_v44, %s3078_s1 }
 0x6eb   : > { %v1433_v16 = vpop.xlane.xlu1 %1432 }
 0x6ec   : > { %2997 = vrcp.f32 %v1433_v16 }
 0x6ef   : > { %v1436_v17 = vpop.xlane.xlu1 %1435 }
 0x6f0   : > { %2999 = vrcp.f32 %v1436_v17 }
 0x6f3   : > { %v1592_v24 = vpop.permute.xlu1 %1591 }
 0x6f4   : > { %v1597_v26 = vsel %vm1102_vm3, %v1592_v24, 0 }
 0x6f6   : > { %v2998_v18 = vpop.eup %2997 }
 0x6f7   : > { %v1439_v19 = vmul.f32 %v2998_v18, %v2994_v11  ;;  %v1590_v28 = vpop.permute.xlu1 %1589 }
 0x6f9   : > { %v1441_v20 = vpack.c.bf16 %v1439_v19, %v1439_v19 }
 0x6fa   : > { %v3000_v21 = vpop.eup %2999 }
 0x6fb   : > { %v1440_v23 = vmul.f32 %v3000_v21, %v2996_v13  ;;  %2814 = vmatmul.mubr.msk.bf16.vlgmr.msra.gmra.mrb[12].mxu1 %vm1102_vm3, %v1441_v20 }
 0x6fc   : > { %2824 = vmatpush3.bf16.xpose.msra.mxu1 %v1547_v22  ;;  %2825 = vmatprep.mubr.msk.bf16.mxu1 %vm3070_vm1, %v3069_v31 }
 0x6fd   : > { %v1442_v25 = vpack.c.bf16 %v1440_v23, %v1440_v23  ;;  %2835 = vmatprep.subr.bf16.mxu1 %v3069_v31 }
 0x6ff   : > { %2820 = vmatmul.mubr.msk.bf16.vlgmr.msra.gmra.mrb[16].mxu0 %vm1102_vm3, %v1442_v25 }
 0x700   : > { %2830 = vmatpush3.bf16.xpose.msra.mxu0 %v1597_v26  ;;  %2831 = vmatprep.mubr.msk.bf16.mxu0 %vm3070_vm1, %v3069_v31 }
 0x701   : > { %2841 = vmatprep.subr.bf16.mxu0 %v3069_v31 }
 0x703   : > { %2826 = vmatmul.mubr.msk.bf16.vlgmr.msra.gmra.mrb[16].mxu1 %vm1102_vm3, %v1540_v27 }
 0x704   : > { %2837 = vmatprep.mubr.msk.bf16.mxu1 %vm3070_vm1, %v3069_v31 }
 0x707   : > { %2832 = vmatmul.mubr.msk.bf16.vlgmr.msra.gmra.mrb[20].mxu0 %vm1102_vm3, %v1590_v28 }
 0x708   : > { %2843 = vmatprep.mubr.msk.bf16.mxu0 %vm3070_vm1, %v3069_v31 }
 0x7ce   : > { %v3422_v29 = vpop.f32.mrb[12].mxu1 }
 0x7cf   : > { %v2815_v30 = vpop.f32.mrb[13].mxu1 }
 0x7d0   : > { %v1488_v32 = vpop.f32.mrb[14].mxu1 }
 0x7d1   : > { %v2816_v35 = vpop.f32.mrb[15].mxu1 }
 0x7d2   : > { %v3424_v36 = vpop.f32.mrb[16].mxu0 }
 0x7d3   : > { %v2960_v37 = vpack.i.bf16 %v3424_v36, %v3422_v29  ;;  %v2821_v38 = vpop.f32.mrb[17].mxu0 }
 0x7d4   : > { %v1536_v39 = vpop.f32.mrb[18].mxu0 }
 0x7d5   : > { %v2822_v40 = vpop.f32.mrb[19].mxu0 }
 0x7d6   : > { %v1583_v43 = vpop.f32.mrb[16].mxu1 }
 0x7d7   : > { %v1584_v45 = vadd.f32 %v1583_v43, %v3350_v59  ;;  %v2827_v46 = vpop.f32.mrb[17].mxu1 }
 0x7d8   : > { %v1586_v48 = vpop.f32.mrb[18].mxu1 }
 0x7d9   : > { %v2828_v49 = vpop.f32.mrb[19].mxu1  ;;  %v1639_v50 = vsel %vm1102_vm3, %v1584_v45, -inf }
 0x7da   : > { %1640 = vmax.xlane.f32.xlu0 %v1639_v50  ;;  %v1633_v51 = vpop.f32.mrb[20].mxu0 }
 0x7db   : > { %v1634_v52 = vadd.f32 %v1633_v51, %v3353_v0  ;;  %v2833_v53 = vpop.f32.mrb[21].mxu0 }
 0x7dc   : > { %v1636_v54 = vpop.f32.mrb[22].mxu0 }
 0x7dd   : > { %v2834_v55 = vpop.f32.mrb[23].mxu0  ;;  %v1642_v56 = vsel %vm1102_vm3, %v1634_v52, -inf }
 0x7de   : > { %1643 = vmax.xlane.f32.xlu1 %v1642_v56 }
 0x7ef   : > { %1663 = vrot.lane.b32.xlu1 %v3327_v41, %s3079_s7 }
 0x7f3   : > { %1761 = vrot.lane.b32.xlu1 %v3327_v41, %s3080_s8 }
 0x7f7   : > { %1811 = vrot.lane.b32.xlu1 %v3330_v44, %s3080_s8 }
 0x7fb   : > { %1809 = vrot.lane.b32.xlu1 %v3330_v44, %s3081_s9 }
 0x867   : > { %v1641_v57 = vpop.xlane.xlu0 %1640 }
 0x868   : > { %v1645_v58 = vsub.f32 %v1584_v45, %v1641_v57 }
 0x86a   : > { %v1647_v60 = vmul.f32 1.442695, %v1645_v58 }
 0x86b   : > { %v1644_v61 = vpop.xlane.xlu1 %1643 }
 0x86c   : > { %3001 = vpow2.f32 %v1647_v60  ;;  %v1646_v62 = vsub.f32 %v1634_v52, %v1644_v61 }
 0x86e   : > { %v1649_v63 = vmul.f32 1.442695, %v1646_v62 }
 0x86f   : > { %v1664_v1 = vpop.permute.xlu1 %1663 }
 0x870   : > { %3003 = vpow2.f32 %v1649_v63  ;;  %v1669_v2 = vsel %vm1227_vm4, %v1664_v1, 0 }
 0x871   : > { %2836 = vmatpush3.bf16.msra.mxu1 %v1669_v2 }
 0x872   : > { %2847 = vmatprep.subr.bf16.mxu1 %v3069_v31 }
 0x873   : > { %v1762_v12 = vpop.permute.xlu1 %1761 }
 0x874   : > { %v1767_v16 = vsel %vm1102_vm3, %v1762_v12, 0 }
 0x876   : > { %v3002_v3 = vpop.eup %3001 }
 0x877   : > { %v1651_v4 = vsel %vm1102_vm3, %v3002_v3, 0.0  ;;  %v1812_v18 = vpop.permute.xlu1 %1811 }
 0x878   : > { %1652 = vadd.xlane.f32.xlu0 %v1651_v4  ;;  %v1817_v20 = vsel %vm1102_vm3, %v1812_v18, 0 }
 0x87a   : > { %v3004_v5 = vpop.eup %3003 }
 0x87b   : > { %v1654_v6 = vsel %vm1102_vm3, %v3004_v5, 0.0  ;;  %v1810_v22 = vpop.permute.xlu1 %1809 }
 0x87c   : > { %1655 = vadd.xlane.f32.xlu0 %v1654_v6 }
 0x892   : > { %1711 = vrot.lane.b32.xlu0 %v3330_v44, %s3079_s7 }
 0x896   : > { %1759 = vrot.lane.b32.xlu0 %v3327_v41, %s3081_s9 }
 0x905   : > { %v1653_v7 = vpop.xlane.xlu0 %1652 }
 0x906   : > { %3005 = vrcp.f32 %v1653_v7  ;;  %v2977_v7 = vld [vmem:[%s3637_s12] sm:$0xff]  }
 0x909   : > { %v1656_v8 = vpop.xlane.xlu0 %1655 }
 0x90a   : > { %3007 = vrcp.f32 %v1656_v8  ;;  %v2978_v8 = vld [vmem:[%s3637_s12 + $0x8] sm:$0xff]  }
 0x90d   : > { %v1712_v9 = vpop.permute.xlu0 %1711 }
 0x90e   : > { %v1717_v10 = vsel %vm1227_vm4, %v1712_v9, 0 }
 0x90f   : > { %2842 = vmatpush3.bf16.msra.mxu0 %v1717_v10 }
 0x910   : > { %v3006_v11 = vpop.eup %3005  ;;  %2853 = vmatprep.subr.bf16.mxu0 %v3069_v31 }
 0x911   : > { %v1659_v13 = vmul.f32 %v3006_v11, %v3002_v3  ;;  %v1760_v21 = vpop.permute.xlu0 %1759 }
 0x913   : > { %v1661_v14 = vpack.c.bf16 %v1659_v13, %v1659_v13 }
 0x914   : > { %v3008_v15 = vpop.eup %3007 }
 0x915   : > { %v1660_v17 = vmul.f32 %v3008_v15, %v3004_v5  ;;  %2838 = vmatmul.mubr.msk.bf16.vlgmr.msra.gmra.mrb[20].mxu1 %vm1102_vm3, %v1661_v14 }
 0x916   : > { %2848 = vmatpush3.bf16.xpose.msra.mxu1 %v1767_v16  ;;  %2849 = vmatprep.mubr.msk.bf16.mxu1 %vm3070_vm1, %v3069_v31 }
 0x917   : > { %v1662_v19 = vpack.c.bf16 %v1660_v17, %v1660_v17  ;;  %2859 = vmatprep.subr.bf16.mxu1 %v3069_v31 }
 0x919   : > { %2844 = vmatmul.mubr.msk.bf16.vlgmr.msra.gmra.mrb[24].mxu0 %vm1102_vm3, %v1662_v19 }
 0x91a   : > { %2854 = vmatpush3.bf16.xpose.msra.mxu0 %v1817_v20  ;;  %2855 = vmatprep.mubr.msk.bf16.mxu0 %vm3070_vm1, %v3069_v31 }
 0x91b   : > { %2865 = vmatprep.subr.bf16.mxu0 %v3069_v31 }
 0x91d   : > { %2850 = vmatmul.mubr.msk.bf16.vlgmr.msra.gmra.mrb[24].mxu1 %vm1102_vm3, %v1760_v21 }
 0x91e   : > { %2861 = vmatprep.mubr.msk.bf16.mxu1 %vm3070_vm1, %v3069_v31 }
 0x921   : > { %2856 = vmatmul.mubr.msk.bf16.vlgmr.msra.gmra.mrb[28].mxu0 %vm1102_vm3, %v1810_v22 }
 0x922   : > { %2867 = vmatprep.mubr.msk.bf16.mxu0 %vm3070_vm1, %v3069_v31 }
 0x9e8   : > { %v1705_v23 = vpop.f32.mrb[20].mxu1 }
 0x9e9   : > { %v2839_v24 = vpop.f32.mrb[21].mxu1 }
 0x9ea   : > { %v1708_v25 = vpop.f32.mrb[22].mxu1 }
 0x9eb   : > { %v2840_v26 = vpop.f32.mrb[23].mxu1 }
 0x9ec   : > { %v1753_v27 = vpop.f32.mrb[24].mxu0 }
 0x9ed   : > { %v2965_v28 = vpack.i.bf16 %v1753_v27, %v1705_v23  ;;  %v2845_v30 = vpop.f32.mrb[25].mxu0 }
 0x9ee   : > { %v1756_v32 = vpop.f32.mrb[26].mxu0 }
 0x9ef   : > { %v2846_v35 = vpop.f32.mrb[27].mxu0 }
 0x9f0   : > { %v1803_v38 = vpop.f32.mrb[24].mxu1 }
 0x9f1   : > { %v1804_v39 = vadd.f32 %v1803_v38, %v3350_v59  ;;  %v2851_v40 = vpop.f32.mrb[25].mxu1 }
 0x9f2   : > { %v1806_v43 = vpop.f32.mrb[26].mxu1 }
 0x9f3   : > { %v2852_v45 = vpop.f32.mrb[27].mxu1  ;;  %v1859_v46 = vsel %vm1102_vm3, %v1804_v39, -inf }
 0x9f4   : > { %1860 = vmax.xlane.f32.xlu0 %v1859_v46  ;;  %v1853_v48 = vpop.f32.mrb[28].mxu0 }
 0x9f5   : > { %v1854_v49 = vadd.f32 %v1853_v48, %v3353_v0  ;;  %v2857_v50 = vpop.f32.mrb[29].mxu0 }
 0x9f6   : > { %v1856_v51 = vpop.f32.mrb[30].mxu0 }
 0x9f7   : > { %v2858_v52 = vpop.f32.mrb[31].mxu0  ;;  %v1862_v53 = vsel %vm1102_vm3, %v1854_v49, -inf }
 0x9f8   : > { %1863 = vmax.xlane.f32.xlu1 %v1862_v53 }
 0xa09   : > { %1883 = vrot.lane.b32.xlu1 %v3327_v41, %s3082_s10 }
 0xa0d   : > { %2961 = vrot.lane.b32.xlu1 %v2960_v37, %s3083_s19 }
 0xa11   : > { %2966 = vrot.lane.b32.xlu1 %v2965_v28, %s3084_s22 }
 0xa81   : > { %v1861_v59 = vpop.xlane.xlu0 %1860 }
 0xa82   : > { %v1865_v54 = vsub.f32 %v1804_v39, %v1861_v59 }
 0xa84   : > { %v1867_v55 = vmul.f32 1.442695, %v1865_v54 }
 0xa85   : > { %v1864_v0 = vpop.xlane.xlu1 %1863 }
 0xa86   : > { %3009 = vpow2.f32 %v1867_v55  ;;  %v1866_v56 = vsub.f32 %v1854_v49, %v1864_v0 }
 0xa88   : > { %v1869_v57 = vmul.f32 1.442695, %v1866_v56 }
 0xa89   : > { %v1884_v58 = vpop.permute.xlu1 %1883 }
 0xa8a   : > { %3011 = vpow2.f32 %v1869_v57  ;;  %v1889_v60 = vsel %vm1227_vm4, %v1884_v58, 0 }
 0xa8b   : > { %2860 = vmatpush3.bf16.msra.mxu1 %v1889_v60 }
 0xa8c   : > { %2871 = vmatprep.subr.bf16.mxu1 %v3069_v31 }
 0xa8d   : > { %v2962_v18 = vpop.permute.xlu1 %2961 }
 0xa8e   : > { %v2964_v20 = vunpack.i.h.bf16 %v2962_v18  ;;  %v2963_v21 = vunpack.i.l.bf16 %v2962_v18 }
 0xa90   : > { %v3010_v41 = vpop.eup %3009  ;;  %v2004_v25 = vsel %vm1102_vm3, %v3388_v47, %v2964_v20  ;;  %v2003_v26 = vsel %vm1102_vm3, %v3386_v42, %v2963_v21  ;;  %v2699_v47 = vld [vmem:[%s3639_s15] ss:$0 sm:$0xff] }
 0xa91   : > { %v1871_v29 = vsel %vm1102_vm3, %v3010_v41, 0.0  ;;  %v2967_v19 = vpop.permute.xlu1 %2966 }
 0xa92   : > { %1872 = vadd.xlane.f32.xlu0 %v1871_v29  ;;  %v2969_v22 = vunpack.i.h.bf16 %v2967_v19  ;;  %v2968_v23 = vunpack.i.l.bf16 %v2967_v19 }
 0xa94   : > { %v3012_v36 = vpop.eup %3011  ;;  %v2006_v30 = vsel %vm2005_vm5, %v2003_v26, %v2968_v23  ;;  %v2007_v32 = vsel %vm2005_vm5, %v2004_v25, %v2969_v22 }
 0xa95   : > { %v1874_v37 = vsel %vm1102_vm3, %v3012_v36, 0.0 }
 0xa96   : > { %1875 = vadd.xlane.f32.xlu0 %v1874_v37 }
 0xaac   : > { %1931 = vrot.lane.b32.xlu0 %v3330_v44, %s3082_s10 }
 0xb1f   : > { %v1873_v61 = vpop.xlane.xlu0 %1872 }
 0xb20   : > { %3013 = vrcp.f32 %v1873_v61 }
 0xb23   : > { %v1876_v62 = vpop.xlane.xlu0 %1875 }
 0xb24   : > { %3015 = vrcp.f32 %v1876_v62 }
 0xb27   : > { %v1932_v63 = vpop.permute.xlu0 %1931 }
 0xb28   : > { %v1937_v1 = vsel %vm1227_vm4, %v1932_v63, 0 }
 0xb29   : > { %2866 = vmatpush3.bf16.msra.mxu0 %v1937_v1 }
 0xb2a   : > { %v3014_v2 = vpop.eup %3013  ;;  %2879 = vmatprep.subr.bf16.mxu0 %v3069_v31 }
 0xb2b   : > { %v1879_v3 = vmul.f32 %v3014_v2, %v3010_v41  ;;  %v2980_v41 = vld [vmem:[%s3259_s4 + $0x8] sm:$0xff]   ;;  %v2703_v2 = vld [vmem:[%s3641_s28] ss:$0 sm:$0xff] }
 0xb2d   : > { %v1881_v4 = vpack.c.bf16 %v1879_v3, %v1879_v3 }
 0xb2e   : > { %v3016_v5 = vpop.eup %3015 }
 0xb2f   : > { %v1880_v6 = vmul.f32 %v3016_v5, %v3012_v36  ;;  %2862 = vmatmul.mubr.msk.bf16.vlgmr.msra.gmra.mrb[28].mxu1 %vm1102_vm3, %v1881_v4 }
 0xb30   : > { %2875 = vmatprep.mubr.msk.bf16.mxu1 %vm3070_vm1, %v3069_v31  ;;  %2872 = vmatpush3.bf16.msra.mxu1 %v2977_v7 }
 0xb31   : > { %v1882_v44 = vpack.c.bf16 %v1880_v6, %v1880_v6  ;;  %2873 = vmatprep.subr.bf16.mxu1 %v3069_v31 }
 0xb33   : > { %2868 = vmatmul.mubr.msk.bf16.vlgmr.msra.gmra.mrb[32].mxu0 %vm1102_vm3, %v1882_v44  ;;  %v2704_v44 = vld [vmem:[%s3643_s21] ss:$0 sm:$0xff] }
 0xb34   : > { %2883 = vmatprep.mubr.msk.bf16.mxu0 %vm3070_vm1, %v3069_v31  ;;  %2874 = vmatpush3.bf16.msra.mxu1 %v2978_v8 }
 0xb35   : > { %2887 = vmatprep.subr.bf16.mxu1 %v3069_v31 }
 0xc02   : > { %v1925_v9 = vpop.f32.mrb[28].mxu1 }
 0xc03   : > { %v2863_v10 = vpop.f32.mrb[29].mxu1 }
 0xc04   : > { %v1928_v11 = vpop.f32.mrb[30].mxu1 }
 0xc05   : > { %v2864_v12 = vpop.f32.mrb[31].mxu1  ;;  %v2981_v11 = vld [vmem:[%s3276_s27] sm:$0xff]  }
 0xc06   : > { %v1973_v13 = vpop.f32.mrb[32].mxu0  ;;  %v2982_v12 = vld [vmem:[%s3276_s27 + $0x8] sm:$0xff]  }
 0xc07   : > { %v2970_v14 = vpack.i.bf16 %v1973_v13, %v1925_v9  ;;  %v2869_v15 = vpop.f32.mrb[33].mxu0  ;;  %v2983_v13 = vld [vmem:[%s3276_s27 + $0x10] sm:$0xff]  }
 0xc08   : > { %v1976_v16 = vpop.f32.mrb[34].mxu0  ;;  %v2705_v15 = vld [vmem:[%s902_s18] ss:$0 sm:$0xff] }
 0xc09   : > { %2971 = vrot.lane.b32.xlu0 %v2970_v14, %s3085_s23  ;;  %v2870_v17 = vpop.f32.mrb[35].mxu0  ;;  %v2984_v14 = vld [vmem:[%s3276_s27 + $0x18] sm:$0xff]  }
 0xc7b   : > { %v2972_v24 = vpop.permute.xlu0 %2971 }
 0xc7c   : > { %v2974_v27 = vunpack.i.h.bf16 %v2972_v24  ;;  %v2973_v28 = vunpack.i.l.bf16 %v2972_v24 }
 0xc7e   : > { %v2010_v35 = vsel %vm2008_vm6, %v2007_v32, %v2974_v27  ;;  %v2009_v38 = vsel %vm2008_vm6, %v2006_v30, %v2973_v28 }
 0xc7f   : > { %v2011_v39 = vpack.c.bf16 %v2010_v35, %v2009_v38  ;;  %v2709_v38 = vld [vmem:[%s918_s25] ss:$0 sm:$0xff] }
 0xc81   : > { %2876 = vmatmul.mubr.msk.bf16.vlgmr.msra.gmra.mrb[32].mxu1 %vm1018_vm2, %v2011_v39 }
 0xc82   : > { %2895 = vmatprep.mubr.msk.bf16.mxu1 %vm3070_vm1, %v3069_v31  ;;  %2888 = vmatpush3.bf16.msra.mxu1 %v2981_v11 }
 0xc83   : > { %2889 = vmatprep.subr.bf16.mxu1 %v3069_v31 }
 0xc86   : > { %2890 = vmatpush3.bf16.msra.mxu1 %v2982_v12 }
 0xc87   : > { %2891 = vmatprep.subr.bf16.mxu1 %v3069_v31 }
 0xc8a   : > { %2892 = vmatpush3.bf16.msra.mxu1 %v2983_v13 }
 0xc8b   : > { %2893 = vmatprep.subr.bf16.mxu1 %v3069_v31 }
 0xc8e   : > { %2894 = vmatpush3.bf16.msra.mxu1 %v2984_v14 }
 0xd54   : > { %v2072_v40 = vpop.f32.mrb[32].mxu1 }
 0xd55   : > { %v2073_v43 = vadd.f32 %v2699_v47, %v2072_v40  ;;  %v2877_v42 = vpop.f32.mrb[33].mxu1 }
 0xd56   : > { %v2075_v45 = vpop.f32.mrb[34].mxu1 }
 0xd57   : > { %v2076_v46 = vadd.f32 %v2699_v47, %v2075_v45  ;;  %v2878_v48 = vpop.f32.mrb[35].mxu1  ;;  %v2079_v49 = vadd.f32 %v2073_v43, %v3309_v33 }
 0xd59   : > { %v2083_v50 = vsel %vm1018_vm2, %v2079_v49, 0.0  ;;  %v2080_v51 = vadd.f32 %v2076_v46, %v3311_v34  ;;  %v2979_v34 = vld [vmem:[%s3259_s4] sm:$0xff]  }
 0xd5a   : > { %2084 = vadd.xlane.f32.xlu1 %v2083_v50  ;;  %2880 = vmatpush3.bf16.msra.mxu0 %v2979_v34 }
 0xd5b   : > { %v2086_v52 = vsel %vm1018_vm2, %v2080_v51, 0.0  ;;  %2881 = vmatprep.subr.bf16.mxu0 %v3069_v31 }
 0xd5c   : > { %2087 = vadd.xlane.f32.xlu0 %v2086_v52 }
 0xd5e   : > { %2882 = vmatpush3.bf16.msra.mxu0 %v2980_v41 }
 0xde7   : > { %v2085_v53 = vpop.xlane.xlu1 %2084 }
 0xde8   : > { %v2090_v59 = vmul.f32 0.03125, %v2085_v53 }
 0xde9   : > { %v2088_v54 = vpop.xlane.xlu0 %2087 }
 0xdea   : > { %v2092_v55 = vsub.f32 %v2079_v49, %v2090_v59  ;;  %v2091_v0 = vmul.f32 0.03125, %v2088_v54 }
 0xdec   : > { %v2093_v56 = vsub.f32 %v2080_v51, %v2091_v0  ;;  %v2094_v57 = vmul.f32 %v2092_v55, %v2092_v55 }
 0xdee   : > { %v2096_v58 = vsel %vm1018_vm2, %v2094_v57, 0.0  ;;  %v2095_v33 = vmul.f32 %v2093_v56, %v2093_v56 }
 0xdef   : > { %2097 = vadd.xlane.f32.xlu0 %v2096_v58 }
 0xdf0   : > { %v2099_v60 = vsel %vm1018_vm2, %v2095_v33, 0.0 }
 0xdf1   : > { %2100 = vadd.xlane.f32.xlu1 %v2099_v60 }
 0xe7c   : > { %v2098_v29 = vpop.xlane.xlu0 %2097 }
 0xe7d   : > { %v2102_v36 = vmul.f32 0.03125, %v2098_v29 }
 0xe7e   : > { %v2101_v37 = vpop.xlane.xlu1 %2100 }
 0xe7f   : > { %v2104_v61 = vadd.f32 1e-12, %v2102_v36  ;;  %v2103_v62 = vmul.f32 0.03125, %v2101_v37 }
 0xe81   : > { %3017 = vrsqrt.f32 %v2104_v61  ;;  %v2105_v63 = vadd.f32 1e-12, %v2103_v62  ;;  %v2715_v61 = vld [vmem:[%s925_s24] ss:$0 sm:$0xff] }
 0xe83   : > { %3019 = vrsqrt.f32 %v2105_v63 }
 0xe8b   : > { %v3018_v1 = vpop.eup %3017 }
 0xe8c   : > { %v2108_v3 = vmul.f32 %v3018_v1, %v2092_v55  ;;  %v2716_v1 = vld [vmem:[%s932_s6] ss:$0 sm:$0xff] }
 0xe8d   : > { %v3020_v4 = vpop.eup %3019 }
 0xe8e   : > { %v2116_v5 = vmul.f32 %v2703_v2, %v2108_v3  ;;  %v2109_v6 = vmul.f32 %v3020_v4, %v2093_v56 }
 0xe90   : > { %v2117_v7 = vmul.f32 %v2703_v2, %v2109_v6  ;;  %v2124_v8 = vadd.f32 %v2704_v44, %v2116_v5 }
 0xe92   : > { %v2125_v9 = vadd.f32 %v2704_v44, %v2117_v7 }
 0xe94   : > { %v2126_v10 = vpack.c.bf16 %v2125_v9, %v2124_v8 }
 0xe96   : > { %2884 = vmatmul.mubr.msk.bf16.vlgmr.msra.gmra.mrb[36].mxu0 %vm1018_vm2, %v2126_v10 }
 0xf69   : > { %v2187_v16 = vpop.f32.mrb[36].mxu0 }
 0xf6a   : > { %v2188_v17 = vadd.f32 %v2705_v15, %v2187_v16  ;;  %v2885_v18 = vpop.f32.mrb[37].mxu0 }
 0xf6b   : > { %v2190_v19 = vpop.f32.mrb[38].mxu0 }
 0xf6c   : > { %v2196_v20 = vmul.f32 0.70710677, %v2188_v17  ;;  %v2191_v21 = vadd.f32 %v2705_v15, %v2190_v19  ;;  %v2886_v22 = vpop.f32.mrb[39].mxu0  ;;  %v2194_v26 = vmul.f32 0.5, %v2188_v17 }
 0xf6e   : > { %3021 = verf.f32 %v2196_v20  ;;  %v2197_v23 = vmul.f32 0.70710677, %v2191_v21  ;;  %v2195_v27 = vmul.f32 0.5, %v2191_v21 }
 0xf70   : > { %3023 = verf.f32 %v2197_v23 }
 0xf78   : > { %v3022_v24 = vpop.eup %3021 }
 0xf79   : > { %v2200_v31 = vadd.f32 1.0, %v3022_v24 }
 0xf7a   : > { %v3024_v25 = vpop.eup %3023 }
 0xf7b   : > { %v2201_v28 = vadd.f32 1.0, %v3024_v25  ;;  %v2202_v30 = vmul.f32 %v2200_v31, %v2194_v26 }
 0xf7d   : > { %v2203_v32 = vmul.f32 %v2201_v28, %v2195_v27 }
 0xf7f   : > { %v2204_v35 = vpack.c.bf16 %v2203_v32, %v2202_v30 }
 0xf81   : > { %2896 = vmatmul.mubr.msk.bf16.vlgmr.msra.gmra.mrb[36].mxu1 %vm2244_vm7, %v2204_v35 }
0x1054   : > { %v2282_v39 = vpop.f32.mrb[36].mxu1 }
0x1055   : > { %v2283_v47 = vadd.f32 %v2709_v38, %v2282_v39  ;;  %v2897_v40 = vpop.f32.mrb[37].mxu1 }
0x1056   : > { %v2285_v43 = vpop.f32.mrb[38].mxu1 }
0x1057   : > { %v2286_v42 = vadd.f32 %v2709_v38, %v2285_v43  ;;  %v2898_v45 = vpop.f32.mrb[39].mxu1  ;;  %v2289_v46 = vadd.f32 %v2283_v47, %v2124_v8 }
0x1059   : > { %v2293_v48 = vsel %vm1018_vm2, %v2289_v46, 0.0  ;;  %v2290_v49 = vadd.f32 %v2286_v42, %v2125_v9 }
0x105a   : > { %2294 = vadd.xlane.f32.xlu0 %v2293_v48 }
0x105b   : > { %v2296_v50 = vsel %vm1018_vm2, %v2290_v49, 0.0 }
0x105c   : > { %2297 = vadd.xlane.f32.xlu1 %v2296_v50 }
0x10e7   : > { %v2295_v51 = vpop.xlane.xlu0 %2294 }
0x10e8   : > { %v2299_v52 = vmul.f32 0.03125, %v2295_v51 }
0x10e9   : > { %v2298_v53 = vpop.xlane.xlu1 %2297 }
0x10ea   : > { %v2301_v59 = vsub.f32 %v2289_v46, %v2299_v52  ;;  %v2300_v54 = vmul.f32 0.03125, %v2298_v53 }
0x10ec   : > { %v2302_v55 = vsub.f32 %v2290_v49, %v2300_v54  ;;  %v2303_v0 = vmul.f32 %v2301_v59, %v2301_v59 }
0x10ee   : > { %v2305_v56 = vsel %vm1018_vm2, %v2303_v0, 0.0  ;;  %v2304_v57 = vmul.f32 %v2302_v55, %v2302_v55 }
0x10ef   : > { %2306 = vadd.xlane.f32.xlu0 %v2305_v56 }
0x10f0   : > { %v2308_v58 = vsel %vm1018_vm2, %v2304_v57, 0.0 }
0x10f1   : > { %2309 = vadd.xlane.f32.xlu1 %v2308_v58 }
0x117c   : > { %v2307_v33 = vpop.xlane.xlu0 %2306 }
0x117d   : > { %v2311_v60 = vmul.f32 0.03125, %v2307_v33 }
0x117e   : > { %v2310_v34 = vpop.xlane.xlu1 %2309 }
0x117f   : > { %v2313_v41 = vadd.f32 1e-12, %v2311_v60  ;;  %v2312_v29 = vmul.f32 0.03125, %v2310_v34 }
0x1181   : > { %3025 = vrsqrt.f32 %v2313_v41  ;;  %v2314_v36 = vadd.f32 1e-12, %v2312_v29 }
0x1183   : > { %3027 = vrsqrt.f32 %v2314_v36 }
0x118b   : > { %v3026_v37 = vpop.eup %3025 }
0x118c   : > { %v2317_v62 = vmul.f32 %v3026_v37, %v2301_v59 }
0x118d   : > { %v3028_v63 = vpop.eup %3027 }
0x118e   : > { %v2325_v2 = vmul.f32 %v2715_v61, %v2317_v62  ;;  %v2318_v3 = vmul.f32 %v3028_v63, %v2302_v55  ;;  %2340 = sbr.rel (%p2717_p8) target bundleno = 4504 (0x1198), region = 92 }
0x1190   : > { %v2333_v4 = vadd.f32 %v2716_v1, %v2325_v2  ;;  %v2326_v5 = vmul.f32 %v2715_v61, %v2318_v3 }
0x1192   : > { %2335 = vst.msk [vmem:[#allocation2] sm:$0xff] %vm1018_vm2, %v2333_v4  ;;  %v2334_v6 = vadd.f32 %v2716_v1, %v2326_v5 }
0x1194   : > { %2336 = vst.msk [vmem:[#allocation2 + $0x8] sm:$0xff] %vm1018_vm2, %v2334_v6  ;;  %v2342_v44 = vrot.slane (!%p2717_p8), %v2334_v6, 7 }
0x1196   : > { %v2345_v7 = vsel %vm2344_vm8, %v2333_v4, %v2342_v44 }
0x1197   : > { %2347 = vst.msk [vmem:[%s936_s17] sm:$0x3] %vm2346_vm9, %v2345_v7 }
0x1198 PF: > { %s3650_s20 = sld [smem:[#allocation6_spill]]  ;;  %s3651_s21 = sld [smem:[#allocation4_spill]] }
0x1199   : > { %s3652_s22 = sld [smem:[#allocation5_spill]]  ;;  %s3653_s23 = sld [smem:[#allocation7_spill]] }
0x119a   : > { %s3654_s24 = sld [smem:[#allocation8_spill]] }
0x119e   : > { %s26_s25 = sadd.s32 1, %s3650_s20  }
0x119f   : > { %p23_p9 = scmp.ge.s32.totalorder %s26_s25, 6  }
0x11a1   :  { %25 = sbr.rel (!%p23_p9) target bundleno = 16 (0x10), region = 167 }

</bundles_post_ra>
